<compile_context>
chip_gen: v7x
topology: tpu7x:2x2x1
jax: 0.10.0
libtpu: 0.0.40
codegen_flags: <defaults>
</compile_context>

<pallas_src>
import numpy as np
import jax
import jax.numpy as jnp
from jax.experimental import pallas as pl
from jax.experimental.pallas import tpu as pltpu


def _pad_geometry(H, W, P):
    """Geometry of the in-kernel zero-padded image scratch.

    Top/bottom halo = P (max dilation).  Left halo is rounded up to a multiple
    of 8 so the interior store starts sublane-aligned; total W is rounded up to
    a multiple of 8 (full f32 sublane tiles).
    """
    pad_t = P
    pad_l = ((P + 7) // 8) * 8
    Hp = H + 2 * pad_t
    Wp = ((pad_l + W + P + 7) // 8) * 8
    return Hp, Wp, pad_t, pad_l


def _make_skconv_kernel(H, W, C, P):
    HW = H * W
    Hp, Wp, PAD_T, PAD_L = _pad_geometry(H, W, P)

    def kernel(x_ref, wc_ref, bc_ref, wd_ref, bd_ref, wa_ref, ba_ref,
               o_ref, xpad_ref, fm_ref):
        # x_ref   : (1, H, W, C)  bf16  NHWC input tile (one batch element)
        # wc_ref  : (P, 9*C, C)   bf16  dense-expanded grouped conv weights,
        #                               3x3 taps folded onto the K axis
        # bc_ref  : (P, 1, C)     f32   conv biases
        # wd_ref  : (C, D)        bf16  descriptor 1x1 weight
        # bd_ref  : (1, D)        f32   descriptor bias
        # wa_ref  : (P, D, C)     bf16  per-path attention 1x1 weights
        # ba_ref  : (P, 1, C)     f32   per-path attention biases
        # o_ref   : (1, H, W, C)  f32   output tile
        # xpad_ref: (Hp, Wp, C)   f32   scratch: zero-padded input image
        # fm_ref  : (P, HW, C)    bf16  scratch: per-path post-ReLU feature maps

        # ---- zero-pad the input in VMEM (no wrapper-side HBM pad pass) ----
        xpad_ref[...] = jnp.zeros_like(xpad_ref)
        xpad_ref[PAD_T:PAD_T + H, PAD_L:PAD_L + W, :] = x_ref[0].astype(jnp.float32)

        # Tap slices shared across paths (e.g. the centre tap) are sliced once.
        tap_cache = {}

        def tap(h0, w0):
            if (h0, w0) not in tap_cache:
                tap_cache[(h0, w0)] = xpad_ref[h0:h0 + H, w0:w0 + W, :]
            return tap_cache[(h0, w0)]

        # ---- grouped dilated 3x3 convs: one big-K bf16 MXU matmul per path ----
        gap_acc = jnp.zeros((1, C), jnp.float32)
        for p in range(P):
            d = p + 1                            # dilation == padding for path p
            taps = [tap(PAD_T - d + d * kh, PAD_L - d + d * kw)
                    for kh in range(3) for kw in range(3)]
            # im2col: (H, W, 9C) -> (HW, 9C); a single (HW,9C)x(9C,C) bf16 dot
            # replaces 9 tiny K=C dots.
            lhs = jnp.concatenate(taps, axis=-1).reshape(HW, 9 * C)
            acc = jnp.dot(lhs.astype(jnp.bfloat16), wc_ref[p],
                          preferred_element_type=jnp.float32)
            acc = jnp.maximum(acc + bc_ref[p], 0.0)   # bias + ReLU (BN identity)
            fm_ref[p] = acc.astype(jnp.bfloat16)
            # Path-sum / GAP numerator fused into the conv epilogue: the values
            # are already in vregs, no later re-read of fm_ref needed.
            gap_acc = gap_acc + jnp.sum(acc, axis=0, keepdims=True)

        gap = gap_acc * (1.0 / HW)                    # (1, C) global average pool

        # ---- descriptor 1x1 conv: C -> D, ReLU ----
        z = jnp.maximum(
            jnp.dot(gap.astype(jnp.bfloat16), wd_ref[...],
                    preferred_element_type=jnp.float32) + bd_ref[...], 0.0)
        zb = z.astype(jnp.bfloat16)

        # ---- per-path attention logits D -> C, softmax over the path axis ----
        logits = [jnp.dot(zb, wa_ref[p], preferred_element_type=jnp.float32)
                  + ba_ref[p] for p in range(P)]
        lmax = logits[0]
        for p in range(1, P):
            lmax = jnp.maximum(lmax, logits[p])
        exps = [jnp.exp(l - lmax) for l in logits]
        den = exps[0]
        for p in range(1, P):
            den = den + exps[p]
        inv = pl.reciprocal(den, approx=True)         # EUP slot, ~free vs divide
        gates = [e * inv for e in exps]               # (1, C) gates, computed once

        # ---- attention-weighted recombination of the path feature maps ----
        out = fm_ref[0].astype(jnp.float32) * gates[0]
        for p in range(1, P):
            out = out + fm_ref[p].astype(jnp.float32) * gates[p]
        # NOTE: C < 128 => half-lane-occupied stores end-to-end; lane-dense
        # configs (C >= 128) would lift VPU/MXU-N/vst utilization.
        o_ref[...] = out.reshape(1, H, W, C).astype(o_ref.dtype)

    return kernel


def skconv_forward(x_nchw, wconv9, bconv, wd, bd, wa, ba):
    """SKConv forward.  x_nchw: (B, C, H, W) f32 -> (B, C, H, W) f32."""
    B, C, H, W = x_nchw.shape
    P = wconv9.shape[0]
    D = wd.shape[1]
    HW = H * W
    Hp, Wp, _, _ = _pad_geometry(H, W, P)

    # NCHW -> NHWC (channels on the 128-lane axis), bf16 at the kernel boundary
    # (halves input DMA bytes); accumulation stays f32 inside the kernel.
    x = jnp.transpose(x_nchw, (0, 2, 3, 1)).astype(jnp.bfloat16)

    kernel = _make_skconv_kernel(H, W, C, P)

    # Weight blocks are grid-invariant (constant index_map), so Pallas does not
    # re-DMA them per grid step; on a 64 MiB-VMEM part (v7x) they could also be
    # single-buffered via pipeline_mode=pl.Buffered(1) to save VMEM.
    grid_spec = pltpu.PrefetchScalarGridSpec(
        num_scalar_prefetch=0,
        grid=(B,),
        in_specs=[
            pl.BlockSpec((1, H, W, C), lambda b: (b, 0, 0, 0)),
            pl.BlockSpec((P, 9 * C, C), lambda b: (0, 0, 0)),
            pl.BlockSpec((P, 1, C), lambda b: (0, 0, 0)),
            pl.BlockSpec((C, D), lambda b: (0, 0)),
            pl.BlockSpec((1, D), lambda b: (0, 0)),
            pl.BlockSpec((P, D, C), lambda b: (0, 0, 0)),
            pl.BlockSpec((P, 1, C), lambda b: (0, 0, 0)),
        ],
        out_specs=pl.BlockSpec((1, H, W, C), lambda b: (b, 0, 0, 0)),
        scratch_shapes=[
            pltpu.VMEM((Hp, Wp, C), jnp.float32),    # zero-padded input image
            pltpu.VMEM((P, HW, C), jnp.bfloat16),    # per-path feature maps
        ],
    )

    out_nhwc = pl.pallas_call(
        kernel,
        out_shape=jax.ShapeDtypeStruct((B, H, W, C), jnp.float32),
        grid_spec=grid_spec,
        compiler_params=pltpu.CompilerParams(
            # batch elements are independent -> megacore sharding on v7x
            dimension_semantics=("parallel",),
            # raise the scoped-VMEM limit (v5e default is only 16 MiB);
            # 64 MiB is <= physical VMEM on every generation.
            vmem_limit_bytes=64 * 1024 * 1024,
        ),
    )(x, wconv9, bconv, wd, bd, wa, ba)

    return jnp.transpose(out_nhwc, (0, 3, 1, 2))


def build_params(C, P, groups, reduction, min_descriptor, key):
    """Deterministic synthetic parameters matching SKConv.__init__ shapes."""
    D = max(C // reduction, min_descriptor)
    cin_pg = C // groups          # input channels per group
    cout_pg = C // groups         # output channels per group

    ks = jax.random.split(key, 6)
    wg = jax.random.normal(ks[0], (P, C, cin_pg, 3, 3), jnp.float32) * 0.1
    bconv = jax.random.normal(ks[1], (P, 1, C), jnp.float32) * 0.01
    wd = jax.random.normal(ks[2], (C, D), jnp.float32) * 0.1
    bd = jax.random.normal(ks[3], (1, D), jnp.float32) * 0.01
    wa = jax.random.normal(ks[4], (P, D, C), jnp.float32) * 0.1
    ba = jax.random.normal(ks[5], (P, 1, C), jnp.float32) * 0.01

    # Expand grouped conv weights (C_out, C_in/groups, 3, 3) into a group-block-
    # sparse dense weight and fold the 3x3 taps onto the K axis:
    # (P, 3, 3, C_in, C_out) -> (P, 9*C_in, C_out), K index = (kh*3+kw)*C + ci.
    # Setup glue only (host side, once).
    wg_np = np.asarray(wg)
    wdense = np.zeros((P, 3, 3, C, C), np.float32)
    for p in range(P):
        for co in range(C):
            g = co // cout_pg
            for cig in range(cin_pg):
                ci = g * cin_pg + cig
                wdense[p, :, :, ci, co] = wg_np[p, co, cig]
    wconv9 = jnp.asarray(wdense.reshape(P, 9 * C, C), dtype=jnp.bfloat16)

    return (wconv9, bconv,
            wd.astype(jnp.bfloat16), bd,
            wa.astype(jnp.bfloat16), ba)


if __name__ == "__main__":
    # Small shapes consistent with the module defaults (groups=32 requires
    # channels divisible by 32).
    B, C, H, W = 2, 64, 8, 8
    P, groups, reduction, min_descriptor = 2, 32, 16, 32

    key = jax.random.PRNGKey(0)
    k_x, k_p = jax.random.split(key)
    x = jax.random.normal(k_x, (B, C, H, W), jnp.float32)

    wconv9, bconv, wd, bd, wa, ba = build_params(
        C, P, groups, reduction, min_descriptor, k_p)

    out = skconv_forward(x, wconv9, bconv, wd, bd, wa, ba)
    out = jax.block_until_ready(out)
    assert out.shape == (B, C, H, W), out.shape
    print("KERNEL_OK")
</pallas_src>

<mosaic_0001>
module attributes {stable_mosaic.version = 11 : i64} {
  func.func @kernel(%arg0: i32, %arg1: memref<1x8x8x64xbf16, #tpu.memory_space<vmem>>, %arg2: memref<2x576x64xbf16, #tpu.memory_space<vmem>>, %arg3: memref<2x1x64xf32, #tpu.memory_space<vmem>>, %arg4: memref<64x32xbf16, #tpu.memory_space<vmem>>, %arg5: memref<1x32xf32, #tpu.memory_space<vmem>>, %arg6: memref<2x32x64xbf16, #tpu.memory_space<vmem>>, %arg7: memref<2x1x64xf32, #tpu.memory_space<vmem>>, %arg8: memref<1x8x8x64xf32, #tpu.memory_space<vmem>>, %arg9: memref<12x24x64xf32, #tpu.memory_space<vmem>>, %arg10: memref<2x64x64xbf16, #tpu.memory_space<vmem>>) attributes {dimension_semantics = [#tpu.dimension_semantics<parallel>], iteration_bounds = array<i64: 2>, scalar_prefetch = 0 : i64, scratch_operands = 2 : i64, tpu.core_type = #tpu.core_type<tc>, window_params = [{transform_indices = @transform_0, window_bounds = array<i64: 1, 8, 8, 64>}, {pipeline_mode = #tpu.pipeline_mode<synchronous>, transform_indices = @transform_1, window_bounds = array<i64: 2, 576, 64>}, {pipeline_mode = #tpu.pipeline_mode<synchronous>, transform_indices = @transform_2, window_bounds = array<i64: 2, 1, 64>}, {pipeline_mode = #tpu.pipeline_mode<synchronous>, transform_indices = @transform_3, window_bounds = array<i64: 64, 32>}, {pipeline_mode = #tpu.pipeline_mode<synchronous>, transform_indices = @transform_4, window_bounds = array<i64: 1, 32>}, {pipeline_mode = #tpu.pipeline_mode<synchronous>, transform_indices = @transform_5, window_bounds = array<i64: 2, 32, 64>}, {pipeline_mode = #tpu.pipeline_mode<synchronous>, transform_indices = @transform_6, window_bounds = array<i64: 2, 1, 64>}, {transform_indices = @transform_7, window_bounds = array<i64: 1, 8, 8, 64>}]} {
    %cst = arith.constant 0.000000e+00 : f32
    %0 = vector.broadcast %cst : f32 to vector<12x24x64xf32>
    %c0 = arith.constant 0 : index
    %c0_0 = arith.constant 0 : index
    %c0_1 = arith.constant 0 : index
    %1 = vector.load %arg9[%c0, %c0_0, %c0_1] : memref<12x24x64xf32, #tpu.memory_space<vmem>>, vector<12x24x64xf32>
    tpu.vector_store %arg9[%c0, %c0_0, %c0_1], %0 {strides = array<i32>} : memref<12x24x64xf32, #tpu.memory_space<vmem>>, vector<12x24x64xf32>,
    %c0_2 = arith.constant 0 : index
    %c0_3 = arith.constant 0 : index
    %c0_4 = arith.constant 0 : index
    %c0_5 = arith.constant 0 : index
    %2 = vector.load %arg1[%c0_2, %c0_3, %c0_4, %c0_5] : memref<1x8x8x64xbf16, #tpu.memory_space<vmem>>, vector<1x8x8x64xbf16>
    %3 = vector.shape_cast %2 : vector<1x8x8x64xbf16> to vector<8x8x64xbf16>
    %4 = arith.extf %3 : vector<8x8x64xbf16> to vector<8x8x64xf32>
    %c2 = arith.constant 2 : index
    %c8 = arith.constant 8 : index
    %c0_6 = arith.constant 0 : index
    %5 = vector.load %arg9[%c2, %c8, %c0_6] : memref<12x24x64xf32, #tpu.memory_space<vmem>>, vector<8x8x64xf32>
    tpu.vector_store %arg9[%c2, %c8, %c0_6], %4 {strides = array<i32>} : memref<12x24x64xf32, #tpu.memory_space<vmem>>, vector<8x8x64xf32>,
    %cst_7 = arith.constant 0.000000e+00 : f32
    %6 = vector.broadcast %cst_7 : f32 to vector<1x64xf32>
    %c1 = arith.constant 1 : index
    %c7 = arith.constant 7 : index
    %c0_8 = arith.constant 0 : index
    %7 = vector.load %arg9[%c1, %c7, %c0_8] : memref<12x24x64xf32, #tpu.memory_space<vmem>>, vector<8x8x64xf32>
    %c1_9 = arith.constant 1 : index
    %c8_10 = arith.constant 8 : index
    %c0_11 = arith.constant 0 : index
    %8 = vector.load %arg9[%c1_9, %c8_10, %c0_11] : memref<12x24x64xf32, #tpu.memory_space<vmem>>, vector<8x8x64xf32>
    %c1_12 = arith.constant 1 : index
    %c9 = arith.constant 9 : index
    %c0_13 = arith.constant 0 : index
    %9 = vector.load %arg9[%c1_12, %c9, %c0_13] : memref<12x24x64xf32, #tpu.memory_space<vmem>>, vector<8x8x64xf32>
    %c2_14 = arith.constant 2 : index
    %c7_15 = arith.constant 7 : index
    %c0_16 = arith.constant 0 : index
    %10 = vector.load %arg9[%c2_14, %c7_15, %c0_16] : memref<12x24x64xf32, #tpu.memory_space<vmem>>, vector<8x8x64xf32>
    %c2_17 = arith.constant 2 : index
    %c8_18 = arith.constant 8 : index
    %c0_19 = arith.constant 0 : index
    %11 = vector.load %arg9[%c2_17, %c8_18, %c0_19] : memref<12x24x64xf32, #tpu.memory_space<vmem>>, vector<8x8x64xf32>
    %c2_20 = arith.constant 2 : index
    %c9_21 = arith.constant 9 : index
    %c0_22 = arith.constant 0 : index
    %12 = vector.load %arg9[%c2_20, %c9_21, %c0_22] : memref<12x24x64xf32, #tpu.memory_space<vmem>>, vector<8x8x64xf32>
    %c3 = arith.constant 3 : index
    %c7_23 = arith.constant 7 : index
    %c0_24 = arith.constant 0 : index
    %13 = vector.load %arg9[%c3, %c7_23, %c0_24] : memref<12x24x64xf32, #tpu.memory_space<vmem>>, vector<8x8x64xf32>
    %c3_25 = arith.constant 3 : index
    %c8_26 = arith.constant 8 : index
    %c0_27 = arith.constant 0 : index
    %14 = vector.load %arg9[%c3_25, %c8_26, %c0_27] : memref<12x24x64xf32, #tpu.memory_space<vmem>>, vector<8x8x64xf32>
    %c3_28 = arith.constant 3 : index
    %c9_29 = arith.constant 9 : index
    %c0_30 = arith.constant 0 : index
    %15 = vector.load %arg9[%c3_28, %c9_29, %c0_30] : memref<12x24x64xf32, #tpu.memory_space<vmem>>, vector<8x8x64xf32>
    %16 = tpu.concatenate %7, %8, %9, %10, %11, %12, %13, %14, %15 in 2 : vector<8x8x64xf32>, vector<8x8x64xf32>, vector<8x8x64xf32>, vector<8x8x64xf32>, vector<8x8x64xf32>, vector<8x8x64xf32>, vector<8x8x64xf32>, vector<8x8x64xf32>, vector<8x8x64xf32> -> vector<8x8x576xf32>
    %17 = vector.shape_cast %16 : vector<8x8x576xf32> to vector<64x576xf32>
    %18 = arith.truncf %17 : vector<64x576xf32> to vector<64x576xbf16>
    %c0_31 = arith.constant 0 : index
    %c0_32 = arith.constant 0 : index
    %c0_33 = arith.constant 0 : index
    %19 = vector.load %arg2[%c0_31, %c0_32, %c0_33] : memref<2x576x64xbf16, #tpu.memory_space<vmem>>, vector<1x576x64xbf16>
    %20 = vector.shape_cast %19 : vector<1x576x64xbf16> to vector<576x64xbf16>
    %cst_34 = arith.constant dense<0.000000e+00> : vector<64x64xf32>
    %21 = tpu.matmul %18, %20, %cst_34 {dimension_numbers = #tpu.dot_dimension_numbers<[1], [0], [0], [1], [0, 0, 1, 1], [], []>} : vector<64x576xbf16>, vector<576x64xbf16>, vector<64x64xf32> -> vector<64x64xf32>
    %c0_35 = arith.constant 0 : index
    %c0_36 = arith.constant 0 : index
    %c0_37 = arith.constant 0 : index
    %22 = vector.load %arg3[%c0_35, %c0_36, %c0_37] : memref<2x1x64xf32, #tpu.memory_space<vmem>>, vector<1x1x64xf32>
    %23 = vector.shape_cast %22 : vector<1x1x64xf32> to vector<1x64xf32>
    %24 = vector.broadcast %23 : vector<1x64xf32> to vector<64x64xf32>
    %25 = arith.addf %21, %24 : vector<64x64xf32>
    %cst_38 = arith.constant 0.000000e+00 : f32
    %26 = vector.broadcast %cst_38 : f32 to vector<64x64xf32>
    %27 = arith.maximumf %25, %26 : vector<64x64xf32>
    %28 = arith.truncf %27 : vector<64x64xf32> to vector<64x64xbf16>
    %c0_39 = arith.constant 0 : index
    %c0_40 = arith.constant 0 : index
    %c0_41 = arith.constant 0 : index
    %29 = vector.load %arg10[%c0_39, %c0_40, %c0_41] : memref<2x64x64xbf16, #tpu.memory_space<vmem>>, vector<1x64x64xbf16>
    %30 = vector.shape_cast %29 : vector<1x64x64xbf16> to vector<64x64xbf16>
    %31 = vector.shape_cast %28 : vector<64x64xbf16> to vector<1x64x64xbf16>
    tpu.vector_store %arg10[%c0_39, %c0_40, %c0_41], %31 {strides = array<i32>} : memref<2x64x64xbf16, #tpu.memory_space<vmem>>, vector<1x64x64xbf16>,
    %cst_42 = arith.constant dense<0.000000e+00> : vector<64xf32>
    %32 = vector.multi_reduction <add>, %27, %cst_42 [0] : vector<64x64xf32> to vector<64xf32>
    %33 = vector.shape_cast %32 : vector<64xf32> to vector<1x64xf32>
    %34 = arith.addf %6, %33 : vector<1x64xf32>
    %c0_43 = arith.constant 0 : index
    %c6 = arith.constant 6 : index
    %c0_44 = arith.constant 0 : index
    %35 = vector.load %arg9[%c0_43, %c6, %c0_44] : memref<12x24x64xf32, #tpu.memory_space<vmem>>, vector<8x8x64xf32>
    %c0_45 = arith.constant 0 : index
    %c8_46 = arith.constant 8 : index
    %c0_47 = arith.constant 0 : index
    %36 = vector.load %arg9[%c0_45, %c8_46, %c0_47] : memref<12x24x64xf32, #tpu.memory_space<vmem>>, vector<8x8x64xf32>
    %c0_48 = arith.constant 0 : index
    %c10 = arith.constant 10 : index
    %c0_49 = arith.constant 0 : index
    %37 = vector.load %arg9[%c0_48, %c10, %c0_49] : memref<12x24x64xf32, #tpu.memory_space<vmem>>, vector<8x8x64xf32>
    %c2_50 = arith.constant 2 : index
    %c6_51 = arith.constant 6 : index
    %c0_52 = arith.constant 0 : index
    %38 = vector.load %arg9[%c2_50, %c6_51, %c0_52] : memref<12x24x64xf32, #tpu.memory_space<vmem>>, vector<8x8x64xf32>
    %c2_53 = arith.constant 2 : index
    %c10_54 = arith.constant 10 : index
    %c0_55 = arith.constant 0 : index
    %39 = vector.load %arg9[%c2_53, %c10_54, %c0_55] : memref<12x24x64xf32, #tpu.memory_space<vmem>>, vector<8x8x64xf32>
    %c4 = arith.constant 4 : index
    %c6_56 = arith.constant 6 : index
    %c0_57 = arith.constant 0 : index
    %40 = vector.load %arg9[%c4, %c6_56, %c0_57] : memref<12x24x64xf32, #tpu.memory_space<vmem>>, vector<8x8x64xf32>
    %c4_58 = arith.constant 4 : index
    %c8_59 = arith.constant 8 : index
    %c0_60 = arith.constant 0 : index
    %41 = vector.load %arg9[%c4_58, %c8_59, %c0_60] : memref<12x24x64xf32, #tpu.memory_space<vmem>>, vector<8x8x64xf32>
    %c4_61 = arith.constant 4 : index
    %c10_62 = arith.constant 10 : index
    %c0_63 = arith.constant 0 : index
    %42 = vector.load %arg9[%c4_61, %c10_62, %c0_63] : memref<12x24x64xf32, #tpu.memory_space<vmem>>, vector<8x8x64xf32>
    %43 = tpu.concatenate %35, %36, %37, %38, %11, %39, %40, %41, %42 in 2 : vector<8x8x64xf32>, vector<8x8x64xf32>, vector<8x8x64xf32>, vector<8x8x64xf32>, vector<8x8x64xf32>, vector<8x8x64xf32>, vector<8x8x64xf32>, vector<8x8x64xf32>, vector<8x8x64xf32> -> vector<8x8x576xf32>
    %44 = vector.shape_cast %43 : vector<8x8x576xf32> to vector<64x576xf32>
    %45 = arith.truncf %44 : vector<64x576xf32> to vector<64x576xbf16>
    %c1_64 = arith.constant 1 : index
    %c0_65 = arith.constant 0 : index
    %c0_66 = arith.constant 0 : index
    %46 = vector.load %arg2[%c1_64, %c0_65, %c0_66] : memref<2x576x64xbf16, #tpu.memory_space<vmem>>, vector<1x576x64xbf16>
    %47 = vector.shape_cast %46 : vector<1x576x64xbf16> to vector<576x64xbf16>
    %cst_67 = arith.constant dense<0.000000e+00> : vector<64x64xf32>
    %48 = tpu.matmul %45, %47, %cst_67 {dimension_numbers = #tpu.dot_dimension_numbers<[1], [0], [0], [1], [0, 0, 1, 1], [], []>} : vector<64x576xbf16>, vector<576x64xbf16>, vector<64x64xf32> -> vector<64x64xf32>
    %c1_68 = arith.constant 1 : index
    %c0_69 = arith.constant 0 : index
    %c0_70 = arith.constant 0 : index
    %49 = vector.load %arg3[%c1_68, %c0_69, %c0_70] : memref<2x1x64xf32, #tpu.memory_space<vmem>>, vector<1x1x64xf32>
    %50 = vector.shape_cast %49 : vector<1x1x64xf32> to vector<1x64xf32>
    %51 = vector.broadcast %50 : vector<1x64xf32> to vector<64x64xf32>
    %52 = arith.addf %48, %51 : vector<64x64xf32>
    %cst_71 = arith.constant 0.000000e+00 : f32
    %53 = vector.broadcast %cst_71 : f32 to vector<64x64xf32>
    %54 = arith.maximumf %52, %53 : vector<64x64xf32>
    %55 = arith.truncf %54 : vector<64x64xf32> to vector<64x64xbf16>
    %c1_72 = arith.constant 1 : index
    %c0_73 = arith.constant 0 : index
    %c0_74 = arith.constant 0 : index
    %56 = vector.load %arg10[%c1_72, %c0_73, %c0_74] : memref<2x64x64xbf16, #tpu.memory_space<vmem>>, vector<1x64x64xbf16>
    %57 = vector.shape_cast %56 : vector<1x64x64xbf16> to vector<64x64xbf16>
    %58 = vector.shape_cast %55 : vector<64x64xbf16> to vector<1x64x64xbf16>
    tpu.vector_store %arg10[%c1_72, %c0_73, %c0_74], %58 {strides = array<i32>} : memref<2x64x64xbf16, #tpu.memory_space<vmem>>, vector<1x64x64xbf16>,
    %cst_75 = arith.constant dense<0.000000e+00> : vector<64xf32>
    %59 = vector.multi_reduction <add>, %54, %cst_75 [0] : vector<64x64xf32> to vector<64xf32>
    %60 = vector.shape_cast %59 : vector<64xf32> to vector<1x64xf32>
    %61 = arith.addf %34, %60 : vector<1x64xf32>
    %cst_76 = arith.constant 1.562500e-02 : f32
    %62 = vector.broadcast %cst_76 : f32 to vector<1x64xf32>
    %63 = arith.mulf %61, %62 : vector<1x64xf32>
    %64 = arith.truncf %63 : vector<1x64xf32> to vector<1x64xbf16>
    %c0_77 = arith.constant 0 : index
    %c0_78 = arith.constant 0 : index
    %65 = vector.load %arg4[%c0_77, %c0_78] : memref<64x32xbf16, #tpu.memory_space<vmem>>, vector<64x32xbf16>
    %cst_79 = arith.constant dense<0.000000e+00> : vector<1x32xf32>
    %66 = tpu.matmul %64, %65, %cst_79 {dimension_numbers = #tpu.dot_dimension_numbers<[1], [0], [0], [1], [0, 0, 1, 1], [], []>} : vector<1x64xbf16>, vector<64x32xbf16>, vector<1x32xf32> -> vector<1x32xf32>
    %c0_80 = arith.constant 0 : index
    %c0_81 = arith.constant 0 : index
    %67 = vector.load %arg5[%c0_80, %c0_81] : memref<1x32xf32, #tpu.memory_space<vmem>>, vector<1x32xf32>
    %68 = arith.addf %66, %67 : vector<1x32xf32>
    %cst_82 = arith.constant 0.000000e+00 : f32
    %69 = vector.broadcast %cst_82 : f32 to vector<1x32xf32>
    %70 = arith.maximumf %68, %69 : vector<1x32xf32>
    %71 = arith.truncf %70 : vector<1x32xf32> to vector<1x32xbf16>
    %c0_83 = arith.constant 0 : index
    %c0_84 = arith.constant 0 : index
    %c0_85 = arith.constant 0 : index
    %72 = vector.load %arg6[%c0_83, %c0_84, %c0_85] : memref<2x32x64xbf16, #tpu.memory_space<vmem>>, vector<1x32x64xbf16>
    %73 = vector.shape_cast %72 : vector<1x32x64xbf16> to vector<32x64xbf16>
    %cst_86 = arith.constant dense<0.000000e+00> : vector<1x64xf32>
    %74 = tpu.matmul %71, %73, %cst_86 {dimension_numbers = #tpu.dot_dimension_numbers<[1], [0], [0], [1], [0, 0, 1, 1], [], []>} : vector<1x32xbf16>, vector<32x64xbf16>, vector<1x64xf32> -> vector<1x64xf32>
    %c0_87 = arith.constant 0 : index
    %c0_88 = arith.constant 0 : index
    %c0_89 = arith.constant 0 : index
    %75 = vector.load %arg7[%c0_87, %c0_88, %c0_89] : memref<2x1x64xf32, #tpu.memory_space<vmem>>, vector<1x1x64xf32>
    %76 = vector.shape_cast %75 : vector<1x1x64xf32> to vector<1x64xf32>
    %77 = arith.addf %74, %76 : vector<1x64xf32>
    %c1_90 = arith.constant 1 : index
    %c0_91 = arith.constant 0 : index
    %c0_92 = arith.constant 0 : index
    %78 = vector.load %arg6[%c1_90, %c0_91, %c0_92] : memref<2x32x64xbf16, #tpu.memory_space<vmem>>, vector<1x32x64xbf16>
    %79 = vector.shape_cast %78 : vector<1x32x64xbf16> to vector<32x64xbf16>
    %cst_93 = arith.constant dense<0.000000e+00> : vector<1x64xf32>
    %80 = tpu.matmul %71, %79, %cst_93 {dimension_numbers = #tpu.dot_dimension_numbers<[1], [0], [0], [1], [0, 0, 1, 1], [], []>} : vector<1x32xbf16>, vector<32x64xbf16>, vector<1x64xf32> -> vector<1x64xf32>
    %c1_94 = arith.constant 1 : index
    %c0_95 = arith.constant 0 : index
    %c0_96 = arith.constant 0 : index
    %81 = vector.load %arg7[%c1_94, %c0_95, %c0_96] : memref<2x1x64xf32, #tpu.memory_space<vmem>>, vector<1x1x64xf32>
    %82 = vector.shape_cast %81 : vector<1x1x64xf32> to vector<1x64xf32>
    %83 = arith.addf %80, %82 : vector<1x64xf32>
    %84 = arith.maximumf %77, %83 : vector<1x64xf32>
    %85 = arith.subf %77, %84 : vector<1x64xf32>
    %86 = math.exp %85 : vector<1x64xf32>
    %87 = arith.subf %83, %84 : vector<1x64xf32>
    %88 = math.exp %87 : vector<1x64xf32>
    %89 = arith.addf %86, %88 : vector<1x64xf32>
    %90 = tpu.reciprocal %89 {approx = true} : vector<1x64xf32> -> vector<1x64xf32>
    %91 = arith.mulf %86, %90 : vector<1x64xf32>
    %92 = arith.mulf %88, %90 : vector<1x64xf32>
    %c0_97 = arith.constant 0 : index
    %c0_98 = arith.constant 0 : index
    %c0_99 = arith.constant 0 : index
    %93 = vector.load %arg10[%c0_97, %c0_98, %c0_99] : memref<2x64x64xbf16, #tpu.memory_space<vmem>>, vector<1x64x64xbf16>
    %94 = vector.shape_cast %93 : vector<1x64x64xbf16> to vector<64x64xbf16>
    %95 = arith.extf %94 : vector<64x64xbf16> to vector<64x64xf32>
    %96 = vector.broadcast %91 : vector<1x64xf32> to vector<64x64xf32>
    %97 = arith.mulf %95, %96 : vector<64x64xf32>
    %c1_100 = arith.constant 1 : index
    %c0_101 = arith.constant 0 : index
    %c0_102 = arith.constant 0 : index
    %98 = vector.load %arg10[%c1_100, %c0_101, %c0_102] : memref<2x64x64xbf16, #tpu.memory_space<vmem>>, vector<1x64x64xbf16>
    %99 = vector.shape_cast %98 : vector<1x64x64xbf16> to vector<64x64xbf16>
    %100 = arith.extf %99 : vector<64x64xbf16> to vector<64x64xf32>
    %101 = vector.broadcast %92 : vector<1x64xf32> to vector<64x64xf32>
    %102 = arith.mulf %100, %101 : vector<64x64xf32>
    %103 = arith.addf %97, %102 : vector<64x64xf32>
    %104 = vector.shape_cast %103 : vector<64x64xf32> to vector<1x8x8x64xf32>
    %c0_103 = arith.constant 0 : index
    %c0_104 = arith.constant 0 : index
    %c0_105 = arith.constant 0 : index
    %c0_106 = arith.constant 0 : index
    %105 = vector.load %arg8[%c0_103, %c0_104, %c0_105, %c0_106] : memref<1x8x8x64xf32, #tpu.memory_space<vmem>>, vector<1x8x8x64xf32>
    tpu.vector_store %arg8[%c0_103, %c0_104, %c0_105, %c0_106], %104 {strides = array<i32>} : memref<1x8x8x64xf32, #tpu.memory_space<vmem>>, vector<1x8x8x64xf32>,
    return
  }
  func.func @transform_0(%arg0: i32) -> (i32, i32, i32, i32) {
    %c0_i32 = arith.constant 0 : i32
    %c0_i32_0 = arith.constant 0 : i32
    %c0_i32_1 = arith.constant 0 : i32
    %c0_i32_2 = arith.constant 0 : i32
    return %arg0, %c0_i32, %c0_i32_0, %c0_i32_1 : i32, i32, i32, i32
  }
  func.func @transform_1(%arg0: i32) -> (i32, i32, i32) {
    %c0_i32 = arith.constant 0 : i32
    %c0_i32_0 = arith.constant 0 : i32
    %c0_i32_1 = arith.constant 0 : i32
    %c0_i32_2 = arith.constant 0 : i32
    return %c0_i32, %c0_i32_0, %c0_i32_1 : i32, i32, i32
  }
  func.func @transform_2(%arg0: i32) -> (i32, i32, i32) {
    %c0_i32 = arith.constant 0 : i32
    %c0_i32_0 = arith.constant 0 : i32
    %c0_i32_1 = arith.constant 0 : i32
    %c0_i32_2 = arith.constant 0 : i32
    return %c0_i32, %c0_i32_0, %c0_i32_1 : i32, i32, i32
  }
  func.func @transform_3(%arg0: i32) -> (i32, i32) {
    %c0_i32 = arith.constant 0 : i32
    %c0_i32_0 = arith.constant 0 : i32
    %c0_i32_1 = arith.constant 0 : i32
    return %c0_i32, %c0_i32_0 : i32, i32
  }
  func.func @transform_4(%arg0: i32) -> (i32, i32) {
    %c0_i32 = arith.constant 0 : i32
    %c0_i32_0 = arith.constant 0 : i32
    %c0_i32_1 = arith.constant 0 : i32
    return %c0_i32, %c0_i32_0 : i32, i32
  }
  func.func @transform_5(%arg0: i32) -> (i32, i32, i32) {
    %c0_i32 = arith.constant 0 : i32
    %c0_i32_0 = arith.constant 0 : i32
    %c0_i32_1 = arith.constant 0 : i32
    %c0_i32_2 = arith.constant 0 : i32
    return %c0_i32, %c0_i32_0, %c0_i32_1 : i32, i32, i32
  }
  func.func @transform_6(%arg0: i32) -> (i32, i32, i32) {
    %c0_i32 = arith.constant 0 : i32
    %c0_i32_0 = arith.constant 0 : i32
    %c0_i32_1 = arith.constant 0 : i32
    %c0_i32_2 = arith.constant 0 : i32
    return %c0_i32, %c0_i32_0, %c0_i32_1 : i32, i32, i32
  }
  func.func @transform_7(%arg0: i32) -> (i32, i32, i32, i32) {
    %c0_i32 = arith.constant 0 : i32
    %c0_i32_0 = arith.constant 0 : i32
    %c0_i32_1 = arith.constant 0 : i32
    %c0_i32_2 = arith.constant 0 : i32
    return %arg0, %c0_i32, %c0_i32_0, %c0_i32_1 : i32, i32, i32, i32
  }
}

</mosaic_0001>

<bundles_post_ra>
// kernel: tpu_custom_call.1
= control target key start
LH: loop header
LB: loop body
LE: loop exit
PB: predicated region body
PF: predicated region fallthrough
CT: control target
= control target key end

     0   :  { %12 = vsyncpa [#allocation5], 0  ;;  %s4307_s0 = inlined_call_operand.hbm [shape: bf16[2,8,8,64], index: 0, kind: input, shape index: {}]   ;;  %s4308_s1 = inlined_call_operand.hbm [shape: bf16[2,576,64], index: 1, kind: input, shape index: {}]   ;;  %s4309_s2 = inlined_call_operand.hbm [shape: f32[2,1,64], index: 2, kind: input, shape index: {}]   ;;  %s4310_s3 = inlined_call_operand.hbm [shape: bf16[64,32], index: 3, kind: input, shape index: {}]   ;;  %s4311_s4 = inlined_call_operand.hbm [shape: f32[1,32], index: 4, kind: input, shape index: {}]   ;;  %s4312_s5 = inlined_call_operand.hbm [shape: bf16[2,32,64], index: 5, kind: input, shape index: {}]   ;;  %s4313_s6 = inlined_call_operand.hbm [shape: f32[2,1,64], index: 6, kind: input, shape index: {}]   ;;  %s4314_s7 = inlined_call_operand.hbm [shape: f32[2,8,8,64], index: 7, kind: output, shape index: {}]  }
   0x1   :  { %14 = vsyncpa [#allocation5 + $0x1], 0 }
   0x2   :  { %15 = vsyncpa [#allocation8], 0 }
   0x3   :  { %16 = vsyncpa [#allocation11], 0 }
   0x4   :  { %17 = vsyncpa [#allocation14], 0 }
   0x5   :  { %18 = vsyncpa [#allocation6], 0 }
   0x6   :  { %20 = vsyncpa [#allocation6 + $0x1], 0  ;;  %s3538_s24 = smov 0   ;;  %s3540_s25 = smov 0  }
   0x7   :  { %s3542_s26 = smov 0   ;;  %s3544_s27 = smov 0  }
   0x8 LB: > { %s3481_s28 = smov [#allocation7]   ;;  %s3559_s30 = sadd.s32 4294967295, %s3479_s27   ;;  %s3479_s27 = sphi %s3544_s27, %s4342_s27   ;;  %s3475_s26 = sphi %s3542_s26, %s4341_s26   ;;  %s3471_s25 = sphi %s3540_s25, %s4340_s25   ;;  %s3467_s24 = sphi %s3538_s24, %s4339_s24  }
   0x9   : > { %s221_s29 = sshll.u32 %s3481_s28, 4  ;;  %p2447_p0 = scmp.ge.s32.totalorder %s3479_s27, 1  ;;  %s3564_s29 = int_to_ptr.vmem [resolvable:$true] %s221_s29 }
   0xa   : > { %p4315_p1 = scmp.eq.s32.totalorder %s3559_s30, 0  ;;  %p209_p2 = scmp.lt.s32.totalorder %s3479_s27, 3 }
   0xb   : > { %s3482_s9 = smov [#allocation10]   ;;  %s3483_s12 = smov [#allocation13]  }
   0xc   : > { %p3566_p3 = pnand %p2447_p0, %p209_p2  ;;  %s247_s10 = sshll.u32 %s3482_s9, 4  ;;  %s3579_s10 = int_to_ptr.vmem [resolvable:$true] %s247_s10 }
   0xd   : > { %s271_s13 = sshll.u32 %s3483_s12, 4  ;;  %s3203_s16 = scalar_lea.hbm %s4308_s1, 9216  ;;  %s3581_s13 = int_to_ptr.vmem [resolvable:$true] %s271_s13 }
   0xe   : > { %s4319_s8 = scalar_select %p3566_p3, 1, 0 }
   0xf   : > { %p2861_p5 = pneg %p3566_p3  ;;  %p3204_p7 = scmp.ne.s32.totalorder %s4308_s1, %s3203_s16 }
  0x10   : > { %p3210_p11 = scmp.lt.u32.totalorder %s3203_s16, %s4308_s1 }
  0x11   : > { %p3575_p6 = pnand %p2861_p5, %p4315_p1 }
  0x13   : > { %p3591_p8 = pneg %p3575_p6 }
  0x15   : > { %p3206_p9 = pnand %p3591_p8, %p3204_p7 }
  0x17   : > { %p3207_p10 = pneg %p3206_p9 }
  0x19   : > { %p3212_p12 = pnand %p3210_p11, %p3207_p10 }
  0x1b   : > { %3215 = shalt.err (!%p3212_p12)
}
  0x1c   : > { %s3216_s22 = scalar_lea.vmem %s3564_s29, 9216  ;;  %p3224_p5 = scmp.lt.s32.totalorder %s3564_s29, %s3564_s29 }
  0x1d   : > { %p3217_p13 = scmp.ne.s32.totalorder %s3564_s29, %s3216_s22  ;;  %p3225_p4 = scmp.lt.s32.totalorder %s3216_s22, %s3216_s22 }
  0x1f   : > { %p3219_p0 = pnand %p3217_p13, %p3591_p8  ;;  %p3226_p7 = por %p3225_p4, %p3224_p5 }
  0x21   : > { %p3220_p2 = pneg %p3219_p0 }
  0x23   : > { %p3227_p9 = pnand %p3226_p7, %p3220_p2 }
  0x25   : > { %3230 = shalt.err (!%p3227_p9)
}
  0x26   : > { %s4317_s23 = smov 64   ;;  %s3485_s28 = smov 4  }
  0x27   : > { %2864 = dma.hbm_to_vmem [thread:$0]  (!%p3575_p6), %s4308_s1, 9216, %s3564_s29, [#allocation8], %s4317_s23, %s4317_s23, %s3485_s28  }
  0x28   : > { %s3231_s16 = scalar_lea.hbm %s4310_s3, 512 }
  0x29   : > { %p3232_p4 = scmp.ne.s32.totalorder %s4310_s3, %s3231_s16  ;;  %p3238_p12 = scmp.lt.u32.totalorder %s3231_s16, %s4310_s3 }
  0x2b   : > { %p3234_p10 = pnand %p3232_p4, %p3591_p8 }
  0x2d   : > { %p3235_p11 = pneg %p3234_p10 }
  0x2f   : > { %p3240_p13 = pnand %p3238_p12, %p3235_p11 }
  0x31   : > { %3243 = shalt.err (!%p3240_p13)
}
  0x32   : > { %s3244_s29 = scalar_lea.vmem %s3579_s10, 512  ;;  %p3252_p7 = scmp.lt.s32.totalorder %s3579_s10, %s3579_s10 }
  0x33   : > { %p3245_p0 = scmp.ne.s32.totalorder %s3579_s10, %s3244_s29  ;;  %p3253_p9 = scmp.lt.s32.totalorder %s3244_s29, %s3244_s29 }
  0x35   : > { %p3247_p2 = pnand %p3245_p0, %p3591_p8  ;;  %p3254_p4 = por %p3253_p9, %p3252_p7 }
  0x37   : > { %p3248_p5 = pneg %p3247_p2 }
  0x39   : > { %p3255_p10 = pnand %p3254_p4, %p3248_p5 }
  0x3b   : > { %3258 = shalt.err (!%p3255_p10)
}
  0x3c   : > { %2870 = dma.hbm_to_vmem [thread:$0]  (!%p3575_p6), %s4310_s3, 512, %s3579_s10, [#allocation11], %s4317_s23, %s4317_s23, %s3485_s28  }
  0x3d   : > { %s3259_s15 = scalar_lea.hbm %s4312_s5, 512 }
  0x3e   : > { %p3260_p11 = scmp.ne.s32.totalorder %s4312_s5, %s3259_s15  ;;  %p3266_p0 = scmp.lt.u32.totalorder %s3259_s15, %s4312_s5 }
  0x40   : > { %p3262_p12 = pnand %p3260_p11, %p3591_p8 }
  0x42   : > { %p3263_p13 = pneg %p3262_p12 }
  0x44   : > { %p3268_p2 = pnand %p3266_p0, %p3263_p13 }
  0x46   : > { %3271 = shalt.err (!%p3268_p2)
}
  0x47   : > { %s3272_s10 = scalar_lea.vmem %s3581_s13, 512  ;;  %p3280_p4 = scmp.lt.s32.totalorder %s3581_s13, %s3581_s13 }
  0x48   : > { %p3273_p5 = scmp.ne.s32.totalorder %s3581_s13, %s3272_s10  ;;  %p3281_p10 = scmp.lt.s32.totalorder %s3272_s10, %s3272_s10 }
  0x4a   : > { %p3275_p7 = pnand %p3273_p5, %p3591_p8  ;;  %p3282_p11 = por %p3281_p10, %p3280_p4 }
  0x4c   : > { %p3276_p9 = pneg %p3275_p7 }
  0x4e   : > { %p3283_p12 = pnand %p3282_p11, %p3276_p9 }
  0x50   : > { %3286 = shalt.err (!%p3283_p12)
}
  0x51   : > { %2876 = dma.hbm_to_vmem [thread:$0]  (!%p3575_p6), %s4312_s5, 512, %s3581_s13, [#allocation14], %s4317_s23, %s4317_s23, %s3485_s28  }
  0x52   : > { %s3486_s22 = smov [#allocation9]   ;;  %s3287_s15 = scalar_lea.hbm %s4309_s2, 32 }
  0x53   : > { %s234_s9 = sshll.u32 %s3486_s22, 4  ;;  %p3288_p13 = scmp.ne.s32.totalorder %s4309_s2, %s3287_s15  ;;  %s235_s9 = int_to_ptr.vmem [resolvable:$true] %s234_s9 }
  0x54   : > { %p3294_p5 = scmp.lt.u32.totalorder %s3287_s15, %s4309_s2 }
  0x55   : > { %p3290_p0 = pnand %p3288_p13, %p3591_p8 }
  0x57   : > { %p3291_p2 = pneg %p3290_p0 }
  0x59   : > { %p3296_p7 = pnand %p3294_p5, %p3291_p2 }
  0x5b   : > { %3299 = shalt.err (!%p3296_p7)
}
  0x5c   : > { %s3300_s13 = scalar_lea.vmem %s235_s9, 32  ;;  %p3308_p11 = scmp.lt.s32.totalorder %s235_s9, %s235_s9 }
  0x5d   : > { %p3301_p9 = scmp.ne.s32.totalorder %s235_s9, %s3300_s13  ;;  %p3309_p12 = scmp.lt.s32.totalorder %s3300_s13, %s3300_s13 }
  0x5f   : > { %p3303_p4 = pnand %p3301_p9, %p3591_p8  ;;  %p3310_p1 = por %p3309_p12, %p3308_p11 }
  0x61   : > { %p3304_p10 = pneg %p3303_p4 }
  0x63   : > { %p3311_p3 = pnand %p3310_p1, %p3304_p10 }
  0x65   : > { %3314 = shalt.err (!%p3311_p3)
}
  0x66   : > { %s3487_s10 = smov 16   ;;  %s3488_s21 = smov 1  }
  0x67   : > { %2867 = dma.hbm_to_vmem [thread:$0]  (!%p3575_p6), %s4309_s2, 32, %s235_s9, [#allocation8], %s3487_s10, %s3487_s10, %s3488_s21  }
  0x68   : > { %s3489_s12 = smov [#allocation12]   ;;  %s3490_s15 = smov [#allocation15]  }
  0x69   : > { %s261_s14 = sshll.u32 %s3489_s12, 4  ;;  %s284_s16 = sshll.u32 %s3490_s15, 4  ;;  %s262_s14 = int_to_ptr.vmem [resolvable:$true] %s261_s14  ;;  %s3688_s16 = int_to_ptr.vmem [resolvable:$true] %s284_s16 }
  0x6a   : > { %s3315_s20 = scalar_lea.hbm %s4311_s4, 16 }
  0x6b   : > { %p3316_p1 = scmp.ne.s32.totalorder %s4311_s4, %s3315_s20  ;;  %p3322_p0 = scmp.lt.u32.totalorder %s3315_s20, %s4311_s4 }
  0x6d   : > { %p3318_p3 = pnand %p3316_p1, %p3591_p8 }
  0x6f   : > { %p3319_p13 = pneg %p3318_p3 }
  0x71   : > { %p3324_p2 = pnand %p3322_p0, %p3319_p13 }
  0x73   : > { %3327 = shalt.err (!%p3324_p2)
}
  0x74   : > { %s3328_s22 = scalar_lea.vmem %s262_s14, 16  ;;  %s3335_s12 = scalar_lea.vmem %s262_s14, 32 }
  0x75   : > { %p3329_p5 = scmp.ne.s32.totalorder %s262_s14, %s3328_s22  ;;  %p3336_p4 = scmp.lt.s32.totalorder %s262_s14, %s262_s14 }
  0x76   : > { %p3337_p10 = scmp.lt.s32.totalorder %s3335_s12, %s3328_s22 }
  0x77   : > { %p3331_p7 = pnand %p3329_p5, %p3591_p8 }
  0x78   : > { %p3338_p11 = por %p3337_p10, %p3336_p4 }
  0x79   : > { %p3332_p9 = pneg %p3331_p7 }
  0x7b   : > { %p3339_p12 = pnand %p3338_p11, %p3332_p9 }
  0x7d   : > { %3342 = shalt.err (!%p3339_p12)
}
  0x7e   : > { %2873 = dma.hbm_to_vmem [thread:$0]  (!%p3575_p6), %s4311_s4, 16, %s262_s14, [#allocation11]  }
  0x7f   : > { %s3343_s20 = scalar_lea.hbm %s4313_s6, 32 }
  0x80   : > { %p3344_p1 = scmp.ne.s32.totalorder %s4313_s6, %s3343_s20  ;;  %p3350_p0 = scmp.lt.u32.totalorder %s3343_s20, %s4313_s6 }
  0x82   : > { %p3346_p3 = pnand %p3344_p1, %p3591_p8 }
  0x84   : > { %p3347_p13 = pneg %p3346_p3 }
  0x86   : > { %p3352_p2 = pnand %p3350_p0, %p3347_p13 }
  0x88   : > { %3355 = shalt.err (!%p3352_p2)
}
  0x89   : > { %s3356_s14 = scalar_lea.vmem %s3688_s16, 32  ;;  %p3364_p4 = scmp.lt.s32.totalorder %s3688_s16, %s3688_s16 }
  0x8a   : > { %p3357_p5 = scmp.ne.s32.totalorder %s3688_s16, %s3356_s14  ;;  %p3365_p10 = scmp.lt.s32.totalorder %s3356_s14, %s3356_s14 }
  0x8c   : > { %p3359_p7 = pnand %p3357_p5, %p3591_p8  ;;  %p3366_p11 = por %p3365_p10, %p3364_p4 }
  0x8e   : > { %p3360_p9 = pneg %p3359_p7 }
  0x90   : > { %p3367_p12 = pnand %p3366_p11, %p3360_p9 }
  0x92   : > { %3370 = shalt.err (!%p3367_p12)
}
  0x93   : > { %2879 = dma.hbm_to_vmem [thread:$0]  (!%p3575_p6), %s4313_s6, 32, %s3688_s16, [#allocation14], %s3487_s10, %s3487_s10, %s3488_s21  }
  0x94   : > { %s2446_s11 = sadd.s32 4294967294, %s3479_s27   ;;  %s3736_s19 = sadd.s32 1, %s3479_s27  }
  0x95   : > { %s30_s15 = ssub.s32 %s3479_s27, %s3736_s19  ;;  %s33_s17 = sadd.s32 1, %s3475_s26 }
  0x96   : > { %p31_p8 = scmp.eq.s32.totalorder %s30_s15, 0  ;;  %p40_p1 = scmp.ne.s32.totalorder %s3475_s26, %s3471_s25 }
  0x97   : > { %p41_p3 = scmp.eq.s32.totalorder %s3479_s27, 0  ;;  %p46_p13 = scmp.ne.s32.totalorder %s3471_s25, %s3467_s24 }
  0x98   : > { %s3747_s18 = scalar_select %p31_p8, %s3475_s26, %s33_s17  }
  0x99   : > { %p3749_p0 = por %p41_p3, %p40_p1  ;;  %p4323_p2 = scmp.eq.s32.totalorder %s3559_s30, 0 }
  0x9a   : > { %p196_p5 = scmp.eq.s32.totalorder %s3559_s30, 1  ;;  %p202_p7 = scmp.eq.s32.totalorder %s2446_s11, 1 }
  0x9b   : > { %p3755_p6 = por %p4323_p2, %p46_p13  ;;  %p2894_p9 = scmp.lt.s32.totalorder %s3479_s27, 2 }
  0x9c   : > { %s298_s21 = sand.u32 1, %s3475_s26   ;;  %p3762_p4 = por %p196_p5, %p40_p1 }
  0x9d   : > { %p3766_p10 = por %p202_p7, %p46_p13  ;;  %s2455_s29 = sshll.u32 %s298_s21, 5 }
  0x9e   : > { %s4325_s16 = scalar_select %p3762_p4, 1, 0 }
  0x9f   : > { %s4326_s13 = scalar_select %p3766_p10, 1, 0 }
  0xa0   : > { %s2565_s9 = sshll.u32 %s3479_s27, 9  ;;  %s302_s23 = scalar_lea.vmem [#allocation4], %s2455_s29 }
  0xa1   : > { %s3774_s12 = scalar_lea.hbm %s4307_s0, %s2565_s9  ;;  %s309_s11 = sshll.u32 %s302_s23, 4  ;;  %s3776_s11 = int_to_ptr.vmem [resolvable:$true] %s309_s11 }
  0xa2   : > { %p3780_p11 = pnand %p2894_p9, %p3749_p0  ;;  %s3784_s17 = scalar_lea.sflag [#allocation5], %s298_s21 }
  0xa3   : > { %s3371_s22 = scalar_lea.hbm %s3774_s12, 512  ;;  %s3376_s20 = scalar_lea.hbm %s4307_s0, 1024 }
  0xa4   : > { %p3372_p12 = scmp.ne.s32.totalorder %s3774_s12, %s3371_s22  ;;  %p3373_p8 = pneg %p3780_p11 }
  0xa5   : > { %p3377_p13 = scmp.lt.u32.totalorder %s3774_s12, %s4307_s0  ;;  %p3378_p0 = scmp.lt.u32.totalorder %s3376_s20, %s3371_s22 }
  0xa6   : > { %p3374_p1 = pnand %p3373_p8, %p3372_p12  ;;  %p3380_p5 = scmp.lt.u32.totalorder %s3371_s22, %s3774_s12 }
  0xa7   : > { %p3379_p2 = por %p3378_p0, %p3377_p13 }
  0xa8   : > { %p3375_p3 = pneg %p3374_p1 }
  0xa9   : > { %p3381_p7 = por %p3380_p5, %p3379_p2 }
  0xab   : > { %p3382_p9 = pnand %p3381_p7, %p3375_p3 }
  0xad   : > { %3385 = shalt.err (!%p3382_p9)
}
  0xae   : > { %s3386_s21 = scalar_lea.vmem %s3776_s11, 512  ;;  %s3491_s29 = smov [#allocation4]  }
  0xaf   : > { %p3387_p12 = scmp.ne.s32.totalorder %s3776_s11, %s3386_s21  ;;  %s3391_s9 = sshll.u32 %s3491_s29, 4  ;;  %s3392_s9 = int_to_ptr.vmem [resolvable:$false] %s3391_s9 }
  0xb0   : > { %s3393_s14 = scalar_lea.vmem %s3392_s9, 1024  ;;  %p3394_p4 = scmp.lt.s32.totalorder %s3776_s11, %s3392_s9 }
  0xb1   : > { %p3389_p1 = pnand %p3387_p12, %p3373_p8  ;;  %p3395_p13 = scmp.lt.s32.totalorder %s3393_s14, %s3386_s21 }
  0xb3   : > { %p3390_p10 = pneg %p3389_p1  ;;  %p3396_p0 = por %p3395_p13, %p3394_p4 }
  0xb5   : > { %p3397_p2 = pnand %p3396_p0, %p3390_p10 }
  0xb7   : > { %3400 = shalt.err (!%p3397_p2)
}
  0xb8   : > { %s4328_s22 = smov 64   ;;  %p4329_p8 = scmp.ne.s32.totalorder %s4319_s8, 0 }
  0xb9   : > { %2883 = dma.hbm_to_vmem [thread:$0]  (!%p3780_p11), %s3774_s12, 512, %s3776_s11, %s3784_s17, %s4328_s22, %s4328_s22, %s3485_s28  }
  0xba   : > { %321 = sbr.rel (%p4329_p8) target bundleno = 1180 (0x49c), region = 48  ;;  %s3818_s20 = sand.u32 (!%p4329_p8), 1, %s3471_s25  }
  0xbb   : > { %s2459_s23 = sshll.u32 (!%p4329_p8), %s3818_s20, 5  ;;  %s324_s21 = scalar_lea.sflag (!%p4329_p8), [#allocation5], %s3818_s20 }
  0xbc   : > { %s3822_s29 = scalar_lea.vmem (!%p4329_p8), [#allocation4], %s2459_s23 }
  0xc1   : > { %3446 = dma.done.wait (%p3755_p6), %s324_s21, 512  }
  0xc2   : > { %3448 = vsyncadd (%p3755_p6), %s324_s21, 4294966784  ;;  %p4330_p4 = scmp.eq.s32.totalorder %s3559_s30, 0 }
  0xc4   : > { %3450 = dma.done.wait (%p4330_p4), [#allocation8], 9248   ;;  %p4331_p10 = pmov %p4330_p4 }
  0xc5   : > { %p4332_p11 = pmov %p4330_p4 }
  0xc6   : > { %3452 = vsyncadd (%p4331_p10), [#allocation8], 4294958048 }
  0xc7   : > { %3454 = dma.done.wait (%p4332_p11), [#allocation11], 528   ;;  %p4333_p3 = pmov %p4330_p4 }
  0xc9   : > { %3456 = vsyncadd (%p4333_p3), [#allocation11], 4294966768  ;;  %p4334_p5 = pmov %p4333_p3 }
  0xca   : > { %p4335_p7 = pmov %p4333_p3 }
  0xcb   : > { %3458 = dma.done.wait (%p4334_p5), [#allocation14], 544  }
  0xcc   : > { %3460 = vsyncadd (%p4335_p7), [#allocation14], 4294966752  ;;  %vm383_vm0 = vcmask 523264   ;;  %v3492_v0 = vmov 0.0   ;;  %v2568_v1 = vld [vmem:[%s3822_s29] sm:$0xff]   ;;  %v2583_v2 = vld [vmem:[%s3822_s29 + $0x8] sm:$0xff]  }
  0xcd   : > { %390 = vst.msk [vmem:[#allocation2 + $0x30] sm:$0xff] %vm383_vm0, %v3492_v0  ;;  %391 = vst.msk [vmem:[#allocation2 + $0x38] sm:$0xff] %vm383_vm0, %v3492_v0  ;;  %v2584_v3 = vld [vmem:[%s3822_s29 + $0x10] sm:$0xff]   ;;  %v2569_v4 = vunpack.c.l.bf16 %v2568_v1  ;;  %v2570_v5 = vunpack.c.h.bf16 %v2568_v1  ;;  %v2573_v6 = vunpack.c.l.bf16 %v2583_v2  ;;  %v2574_v7 = vunpack.c.h.bf16 %v2583_v2  ;;  %v2585_v8 = vld [vmem:[%s3822_s29 + $0x18] sm:$0xff]   ;;  %s3493_s8 = smov 64   ;;  %s2466_s28 = sshll.u32 %s3818_s20, 6 }
  0xce   : > { %393 = vst.msk [vmem:[#allocation2 + $0x48] sm:$0xff] %vm383_vm0, %v3492_v0  ;;  %394 = vst.msk [vmem:[#allocation2 + $0x50] sm:$0xff] %vm383_vm0, %v3492_v0  ;;  %v2577_v9 = vunpack.c.l.bf16 %v2584_v3  ;;  %v2578_v10 = vunpack.c.h.bf16 %v2584_v3  ;;  %v2581_v11 = vunpack.c.l.bf16 %v2585_v8  ;;  %v2582_v12 = vunpack.c.h.bf16 %v2585_v8  ;;  %v3109_v13 = vld [vmem:[#allocation7 + $0x40] sm:$0xff]   ;;  %v3111_v15 = vld [vmem:[#allocation7 + $0x48] sm:$0xff]   ;;  %s2566_s10 = sshll.u32 %s3559_s30, 10  ;;  %s381_s12 = scalar_lea.vmem [#allocation16], %s2466_s28 }
  0xcf   : > { %384 = vst.msk [vmem:[#allocation2] sm:$0xff] %vm383_vm0, %v3492_v0  ;;  %385 = vst.msk [vmem:[#allocation2 + $0x8] sm:$0xff] %vm383_vm0, %v3492_v0  ;;  %v3110_v14 = vld [vmem:[#allocation7] sm:$0xff]   ;;  %2586 = vmatprep.subr.bf16.mxu0 %v3109_v13  ;;  %v3112_v16 = vld [vmem:[#allocation7 + $0x8] sm:$0xff]   ;;  %vm3494_vm1 = vmmov 0   ;;  %vm2124_vm2 = vcmask 261120   ;;  %s4253_s9 = scalar_lea.hbm %s4314_s7, %s2566_s10 }
  0xd0   : > { %386 = vst.msk [vmem:[#allocation2 + $0x10] sm:$0xff] %vm383_vm0, %v3492_v0  ;;  %387 = vst.msk [vmem:[#allocation2 + $0x18] sm:$0xff] %vm383_vm0, %v3492_v0  ;;  %2587 = vmatpush3.bf16.msra.mxu0 %v3110_v14  ;;  %v3113_v17 = vld [vmem:[#allocation7 + $0x50] sm:$0xff]   ;;  %v3115_v20 = vld [vmem:[#allocation7 + $0xc0] sm:$0xff]   ;;  %s2316_s11 = sshll.u32 %s381_s12, 4  ;;  %s2303_s30 = scalar_lea.sflag [#allocation6], %s3818_s20  ;;  %s4255_s11 = int_to_ptr.vmem [resolvable:$true] %s2316_s11 }
  0xd1   : > { %388 = vst.msk [vmem:[#allocation2 + $0x20] sm:$0xff] %vm383_vm0, %v3492_v0  ;;  %389 = vst.msk [vmem:[#allocation2 + $0x28] sm:$0xff] %vm383_vm0, %v3492_v0  ;;  %2588 = vmatprep.subr.bf16.mxu0 %v3111_v15  ;;  %v3114_v19 = vld [vmem:[#allocation7 + $0x10] sm:$0xff]   ;;  %2626 = vmatprep.subr.bf16.mxu1 %v3115_v20  ;;  %v3116_v43 = vld [vmem:[#allocation7 + $0x80] sm:$0xff]   ;;  %s3401_s14 = scalar_lea.vmem %s4255_s11, 1024  ;;  %p4336_p9 = scmp.ne.s32.totalorder %s4325_s16, 0 }
  0xd2   : > { %392 = vst.msk [vmem:[#allocation2 + $0x40] sm:$0xff] %vm383_vm0, %v3492_v0  ;;  %395 = vst.msk [vmem:[#allocation2 + $0x58] sm:$0xff] %vm383_vm0, %v3492_v0  ;;  %v3117_v46 = vld [vmem:[#allocation7 + $0x58] sm:$0xff]   ;;  %2627 = vmatpush3.bf16.msra.mxu1 %v3116_v43  ;;  %v3119_v51 = vld [vmem:[#allocation7 + $0xc8] sm:$0xff]   ;;  %p3402_p6 = scmp.ne.s32.totalorder %s4255_s11, %s3401_s14  ;;  %s3495_s22 = smov [#allocation16]  }
  0xd3   : > { %396 = vst.msk [vmem:[#allocation2 + $0x60] sm:$0xff] %vm383_vm0, %v3492_v0  ;;  %397 = vst.msk [vmem:[#allocation2 + $0x68] sm:$0xff] %vm383_vm0, %v3492_v0  ;;  %v3118_v49 = vld [vmem:[#allocation7 + $0x18] sm:$0xff]   ;;  %v3120_v52 = vld [vmem:[#allocation7 + $0x88] sm:$0xff]   ;;  %2628 = vmatprep.subr.bf16.mxu1 %v3119_v51  ;;  %s3405_s23 = sshll.u32 %s3495_s22, 4  ;;  %s3406_s23 = int_to_ptr.vmem [resolvable:$false] %s3405_s23 }
  0xd4   : > { %398 = vst.msk [vmem:[#allocation2 + $0x70] sm:$0xff] %vm383_vm0, %v3492_v0  ;;  %399 = vst.msk [vmem:[#allocation2 + $0x78] sm:$0xff] %vm383_vm0, %v3492_v0  ;;  %2589 = vmatpush3.bf16.msra.mxu0 %v3112_v16  ;;  %v3121_v53 = vld [vmem:[#allocation7 + $0x60] sm:$0xff]   ;;  %v3123_v59 = vld [vmem:[#allocation7 + $0xd0] sm:$0xff]   ;;  %p3403_p12 = pnand %p3402_p6, %p4336_p9  ;;  %s3407_s21 = scalar_lea.vmem %s3406_s23, 2048 }
  0xd5   : > { %400 = vst.msk [vmem:[#allocation2 + $0x80] sm:$0xff] %vm383_vm0, %v3492_v0  ;;  %401 = vst.msk [vmem:[#allocation2 + $0x88] sm:$0xff] %vm383_vm0, %v3492_v0  ;;  %2590 = vmatprep.subr.bf16.mxu0 %v3113_v17  ;;  %v3122_v57 = vld [vmem:[#allocation7 + $0x20] sm:$0xff]   ;;  %v3124_v60 = vld [vmem:[#allocation7 + $0x90] sm:$0xff]   ;;  %p3408_p13 = scmp.lt.s32.totalorder %s4255_s11, %s3406_s23  ;;  %p3409_p0 = scmp.lt.s32.totalorder %s3407_s21, %s3401_s14 }
  0xd6   : > { %402 = vst.msk [vmem:[#allocation2 + $0x90] sm:$0xff] %vm383_vm0, %v3492_v0  ;;  %403 = vst.msk [vmem:[#allocation2 + $0x98] sm:$0xff] %vm383_vm0, %v3492_v0  ;;  %2629 = vmatpush3.bf16.msra.mxu1 %v3120_v52  ;;  %v3125_v63 = vld [vmem:[#allocation7 + $0x68] sm:$0xff]   ;;  %v3131_v14 = vld [vmem:[#allocation7 + $0xe0] sm:$0xff]   ;;  %p3404_p1 = pneg %p3403_p12 }
  0xd7   : > { %404 = vst.msk [vmem:[#allocation2 + $0xa0] sm:$0xff] %vm383_vm0, %v3492_v0  ;;  %405 = vst.msk [vmem:[#allocation2 + $0xa8] sm:$0xff] %vm383_vm0, %v3492_v0  ;;  %2630 = vmatprep.subr.bf16.mxu1 %v3123_v59  ;;  %v3126_v3 = vld [vmem:[#allocation7 + $0x28] sm:$0xff]   ;;  %v3132_v15 = vld [vmem:[#allocation7 + $0xa0] sm:$0xff]   ;;  %p3410_p2 = por %p3409_p0, %p3408_p13 }
  0xd8   : > { %406 = vst.msk [vmem:[#allocation2 + $0xb0] sm:$0xff] %vm383_vm0, %v3492_v0  ;;  %407 = vst.msk [vmem:[#allocation2 + $0xb8] sm:$0xff] %vm383_vm0, %v3492_v0  ;;  %v3924_v18 = vld [vmem:[#allocation2 + $0x20] sm:$0xff]  ;;  %2591 = vmatpush3.bf16.msra.mxu0 %v3114_v19  ;;  %v3133_v17 = vld [vmem:[#allocation7 + $0x78] sm:$0xff]  }
  0xd9   : > { %408 = vst.msk [vmem:[#allocation2 + $0xc0] sm:$0xff] %vm383_vm0, %v3492_v0  ;;  %409 = vst.msk [vmem:[#allocation2 + $0xc8] sm:$0xff] %vm383_vm0, %v3492_v0  ;;  %2592 = vmatprep.subr.bf16.mxu0 %v3117_v46  ;;  %v3134_v20 = vld [vmem:[#allocation7 + $0x38] sm:$0xff]   ;;  %v4026_v43 = vld [vmem:[#allocation7 + $0x100] sm:$0xff]   ;;  %p3411_p8 = pnand %p3410_p2, %p3404_p1 }
  0xda   : > { %410 = vst.msk [vmem:[#allocation2 + $0xd0] sm:$0xff] %vm383_vm0, %v3492_v0  ;;  %411 = vst.msk [vmem:[#allocation2 + $0xd8] sm:$0xff] %vm383_vm0, %v3492_v0  ;;  %2631 = vmatpush3.bf16.msra.mxu1 %v3124_v60 }
  0xdb   : > { %412 = vst.msk [vmem:[#allocation2 + $0xe0] sm:$0xff] %vm383_vm0, %v3492_v0  ;;  %413 = vst.msk [vmem:[#allocation2 + $0xe8] sm:$0xff] %vm383_vm0, %v3492_v0 }
  0xdc   : > { %414 = vst.msk [vmem:[#allocation2 + $0xf0] sm:$0xff] %vm383_vm0, %v3492_v0  ;;  %415 = vst.msk [vmem:[#allocation2 + $0xf8] sm:$0xff] %vm383_vm0, %v3492_v0  ;;  %2593 = vmatpush3.bf16.msra.mxu0 %v3118_v49  ;;  %v3139_v49 = vld [vmem:[#allocation7 + $0xb0] sm:$0xff]  }
  0xdd   : > { %416 = vst.msk [vmem:[#allocation2 + $0x100] sm:$0xff] %vm383_vm0, %v3492_v0  ;;  %417 = vst.msk [vmem:[#allocation2 + $0x108] sm:$0xff] %vm383_vm0, %v3492_v0  ;;  %2594 = vmatprep.subr.bf16.mxu0 %v3121_v53 }
  0xde   : > { %418 = vst.msk [vmem:[#allocation2 + $0x110] sm:$0xff] %vm383_vm0, %v3492_v0  ;;  %419 = vst.msk [vmem:[#allocation2 + $0x118] sm:$0xff] %vm383_vm0, %v3492_v0 }
  0xdf   : > { %437 = vst.msk [vmem:[#allocation2 + $0x38] sm:$0xff] %vm383_vm0, %v2569_v4  ;;  %438 = vst.msk [vmem:[#allocation2 + $0x50] sm:$0xff] %vm383_vm0, %v2570_v5  ;;  %v3127_v5 = vld [vmem:[#allocation7 + $0xd8] sm:$0xff]  }
  0xe0   : > { %439 = vst.msk [vmem:[#allocation2 + $0x68] sm:$0xff] %vm383_vm0, %v2573_v6  ;;  %440 = vst.msk [vmem:[#allocation2 + $0x80] sm:$0xff] %vm383_vm0, %v2574_v7  ;;  %2595 = vmatpush3.bf16.msra.mxu0 %v3122_v57  ;;  %v3128_v6 = vld [vmem:[#allocation7 + $0x98] sm:$0xff]   ;;  %2632 = vmatprep.subr.bf16.mxu1 %v3127_v5  ;;  %v3143_v57 = vld [vmem:[#allocation7 + $0x160] sm:$0xff]  }
  0xe1   : > { %441 = vst.msk [vmem:[#allocation2 + $0x98] sm:$0xff] %vm383_vm0, %v2577_v9  ;;  %442 = vst.msk [vmem:[#allocation2 + $0xb0] sm:$0xff] %vm383_vm0, %v2578_v10  ;;  %2596 = vmatprep.subr.bf16.mxu0 %v3125_v63  ;;  %v3129_v9 = vld [vmem:[#allocation7 + $0x70] sm:$0xff]   ;;  %2633 = vmatpush3.bf16.msra.mxu1 %v3128_v6 }
  0xe2   : > { %443 = vst.msk [vmem:[#allocation2 + $0xc8] sm:$0xff] %vm383_vm0, %v2581_v11  ;;  %444 = vst.msk [vmem:[#allocation2 + $0xe0] sm:$0xff] %vm383_vm0, %v2582_v12  ;;  %v1247_v11 = vld [vmem:[#allocation2 + $0x8] sm:$0xff]  ;;  %v3130_v12 = vld [vmem:[#allocation7 + $0x30] sm:$0xff]   ;;  %2634 = vmatprep.subr.bf16.mxu1 %v3131_v14 }
  0xe3   : > { %v4000_v62 = vld [vmem:[#allocation2 + $0xf8] sm:$0xff] }
  0xe4   : > { %2597 = vmatpush3.bf16.msra.mxu0 %v3126_v3 }
  0xe5   : > { %2598 = vmatprep.subr.bf16.mxu0 %v3129_v9  ;;  %2635 = vmatpush3.bf16.msra.mxu1 %v3132_v15 }
  0xe6   : > { %v3926_v21 = vld [vmem:[#allocation2 + $0x37] sm:$0xff]  ;;  %v3928_v22 = vld [vmem:[#allocation2 + $0x4f] sm:$0xff] }
  0xe7   : > { %v3930_v23 = vld [vmem:[#allocation2 + $0x67] sm:$0xff]  ;;  %v2949_v24 = vpack.i.bf16 %v3928_v22, %v3926_v21  ;;  %v3934_v25 = vld [vmem:[#allocation2 + $0x7f] sm:$0xff]  ;;  %v3938_v27 = vld [vmem:[#allocation2 + $0x50] sm:$0xff] }
  0xe8   : > { %v3936_v26 = vld [vmem:[#allocation2 + $0x38] sm:$0xff]  ;;  %v2959_v28 = vpack.i.bf16 %v3934_v25, %v3930_v23  ;;  %v3942_v29 = vld [vmem:[#allocation2 + $0x68] sm:$0xff]  ;;  %v3962_v37 = vld [vmem:[#allocation2 + $0x80] sm:$0xff]  ;;  %2599 = vmatpush3.bf16.msra.mxu0 %v3130_v12 }
  0xe9   : > { %2950 = vrot.lane.b32.xlu0 %v2949_v24, %s3493_s8  ;;  %v2954_v30 = vpack.i.bf16 %v3936_v26, %v3924_v18  ;;  %v2964_v31 = vpack.i.bf16 %v3942_v29, %v3938_v27  ;;  %v3950_v32 = vld [vmem:[#allocation2 + $0x97] sm:$0xff]  ;;  %v3952_v33 = vld [vmem:[#allocation2 + $0xaf] sm:$0xff]  ;;  %v3972_v41 = vld [vmem:[#allocation2 + $0xc7] sm:$0xff]  ;;  %v3034_v24 = vpack.i.bf16 %v3924_v18, %v1247_v11  ;;  %2600 = vmatprep.subr.bf16.mxu0 %v3133_v17 }
  0xea   : > { %2960 = vrot.lane.b32.xlu1 %v2959_v28, %s3493_s8  ;;  %v2974_v34 = vpack.i.bf16 %v3952_v33, %v3950_v32  ;;  %v3958_v35 = vld [vmem:[#allocation2 + $0x39] sm:$0xff]  ;;  %v3960_v36 = vld [vmem:[#allocation2 + $0x51] sm:$0xff]  ;;  %v3976_v44 = vld [vmem:[#allocation2 + $0x69] sm:$0xff]  ;;  %v3044_v46 = vpack.i.bf16 %v3938_v27, %v3936_v26 }
  0xeb   : > { %v3964_v38 = vld [vmem:[#allocation2 + $0x98] sm:$0xff]  ;;  %v2979_v39 = vpack.i.bf16 %v3960_v36, %v3958_v35  ;;  %v3978_v45 = vld [vmem:[#allocation2 + $0x81] sm:$0xff]  ;;  %v3981_v47 = vld [vmem:[#allocation2 + $0xb0] sm:$0xff] }
  0xec   : > { %v2984_v40 = vpack.i.bf16 %v3964_v38, %v3962_v37  ;;  %v3974_v42 = vld [vmem:[#allocation2 + $0xdf] sm:$0xff]  ;;  %v3983_v48 = vld [vmem:[#allocation2 + $0xc8] sm:$0xff]  ;;  %v2999_v54 = vpack.i.bf16 %v3978_v45, %v3976_v44  ;;  %v3993_v56 = vld [vmem:[#allocation2 + $0xb1] sm:$0xff]  ;;  %2601 = vmatpush3.bf16.msra.mxu0 %v3134_v20  ;;  %v3079_v6 = vpack.i.bf16 %v3981_v47, %v3964_v38 }
  0xed   : > { %2955 = vrot.lane.b32.xlu0 %v2954_v30, %s3493_s8  ;;  %v2994_v50 = vpack.i.bf16 %v3974_v42, %v3972_v41  ;;  %v3991_v55 = vld [vmem:[#allocation2 + $0x99] sm:$0xff]  ;;  %v3004_v58 = vpack.i.bf16 %v3983_v48, %v3981_v47  ;;  %v4003_v1 = vld [vmem:[#allocation2 + $0xc9] sm:$0xff]  ;;  %v4005_v2 = vld [vmem:[#allocation2 + $0xe1] sm:$0xff]  ;;  %2773 = vmatprep.subr.bf16.mxu0 %v4026_v43 }
  0xee   : > { %2965 = vrot.lane.b32.xlu1 %v2964_v31, %s3493_s8  ;;  %v3998_v61 = vld [vmem:[#allocation2 + $0xe0] sm:$0xff]  ;;  %v3014_v4 = vpack.i.bf16 %v3993_v56, %v3991_v55  ;;  %v4010_v7 = vld [vmem:[#allocation2 + $0x36] sm:$0xff]  ;;  %v4012_v8 = vld [vmem:[#allocation2 + $0x4e] sm:$0xff]  ;;  %v3024_v13 = vpack.i.bf16 %v4005_v2, %v4003_v1 }
  0xef   : > { %v3019_v10 = vpack.i.bf16 %v4000_v62, %v3998_v61  ;;  %v1265_v16 = vld [vmem:[#allocation2 + $0x66] sm:$0xff]  ;;  %v3029_v19 = vpack.i.bf16 %v4012_v8, %v4010_v7  ;;  %v1266_v28 = vld [vmem:[#allocation2 + $0x7e] sm:$0xff]  ;;  %v3138_v18 = vld [vmem:[#allocation7 + $0xf0] sm:$0xff]   ;;  %v3089_v12 = vpack.i.bf16 %v3998_v61, %v3983_v48 }
  0xf0   : > { %v3135_v30 = vld [vmem:[#allocation7 + $0xe8] sm:$0xff]   ;;  %v4033_v52 = vld [vmem:[#allocation2 + $0x3a] sm:$0xff]  ;;  %v4035_v53 = vld [vmem:[#allocation2 + $0x52] sm:$0xff] }
  0xf1   : > { %2970 = vrot.lane.b32.xlu0 %v2964_v31, %s3493_s8  ;;  %v1267_v31 = vld [vmem:[#allocation2 + $0x96] sm:$0xff]  ;;  %2636 = vmatprep.subr.bf16.mxu1 %v3135_v30  ;;  %v1269_v59 = vld [vmem:[#allocation2 + $0xc6] sm:$0xff]  ;;  %v1270_v60 = vld [vmem:[#allocation2 + $0xde] sm:$0xff]  ;;  %v3064_v63 = vpack.i.bf16 %v4035_v53, %v4033_v52 }
  0xf2   : > { %2975 = vrot.lane.b32.xlu1 %v2974_v34, %s3493_s8  ;;  %v3136_v34 = vld [vmem:[#allocation7 + $0xa8] sm:$0xff]   ;;  %v3069_v3 = vpack.i.bf16 %v1270_v60, %v1269_v59  ;;  %v1276_v11 = vld [vmem:[#allocation2 + $0xb2] sm:$0xff] }
  0xf3   : > { %2637 = vmatpush3.bf16.msra.mxu1 %v3136_v34  ;;  %v4048_v5 = vld [vmem:[#allocation2 + $0x82] sm:$0xff]  ;;  %v1277_v15 = vld [vmem:[#allocation2 + $0xca] sm:$0xff] }
  0xf4   : > { %2638 = vmatprep.subr.bf16.mxu1 %v3138_v18 }
  0xf5   : > { %2980 = vrot.lane.b32.xlu0 %v2979_v39, %s3493_s8  ;;  %v3039_v39 = vpack.i.bf16 %v1266_v28, %v1265_v16  ;;  %v1278_v16 = vld [vmem:[#allocation2 + $0xe2] sm:$0xff] }
  0xf6   : > { %2985 = vrot.lane.b32.xlu1 %v2984_v40, %s3493_s8 }
  0xf7   : > { %2639 = vmatpush3.bf16.msra.mxu1 %v3139_v49  ;;  %v446_v49 = vld [vmem:[#allocation2 + $0x1f] sm:$0xff] }
  0xf9   : > { %2990 = vrot.lane.b32.xlu0 %v2984_v40, %s3493_s8  ;;  %v1268_v40 = vld [vmem:[#allocation2 + $0xae] sm:$0xff] }
  0xfa   : > { %2995 = vrot.lane.b32.xlu1 %v2994_v50, %s3493_s8  ;;  %v3140_v50 = vld [vmem:[#allocation7 + $0xf8] sm:$0xff]   ;;  %v3049_v51 = vpack.i.bf16 %v1268_v40, %v1267_v31 }
  0xfb   : > { %2640 = vmatprep.subr.bf16.mxu1 %v3140_v50 }
  0xfd   : > { %3000 = vrot.lane.b32.xlu0 %v2999_v54, %s3493_s8  ;;  %v3141_v54 = vld [vmem:[#allocation7 + $0xb8] sm:$0xff]  }
  0xfe   : > { %3005 = vrot.lane.b32.xlu1 %v3004_v58, %s3493_s8  ;;  %2641 = vmatpush3.bf16.msra.mxu1 %v3141_v54 }
  0xff   : > { %2674 = vmatprep.subr.bf16.mxu1 %v3143_v57 }
 0x101   : > { %3010 = vrot.lane.b32.xlu0 %v3004_v58, %s3493_s8  ;;  %v3059_v58 = vpack.i.bf16 %v3962_v37, %v3942_v29 }
 0x102   : > { %3015 = vrot.lane.b32.xlu1 %v3014_v4, %s3493_s8  ;;  %v4046_v4 = vld [vmem:[#allocation2 + $0x6a] sm:$0xff] }
 0x103   : > { %v3084_v9 = vpack.i.bf16 %v4048_v5, %v4046_v4 }
 0x105   : > { %3020 = vrot.lane.b32.xlu0 %v3019_v10, %s3493_s8  ;;  %v1275_v10 = vld [vmem:[#allocation2 + $0x9a] sm:$0xff] }
 0x106   : > { %3025 = vrot.lane.b32.xlu1 %v3024_v13, %s3493_s8  ;;  %v1295_v13 = vld [vmem:[#allocation2 + $0x110] sm:$0xff]  ;;  %v3094_v14 = vpack.i.bf16 %v1276_v11, %v1275_v10  ;;  %v3142_v10 = vld [vmem:[#allocation7 + $0x108] sm:$0xff]  }
 0x107   : > { %v3099_v17 = vpack.i.bf16 %v1295_v13, %v4000_v62 }
 0x109   : > { %3030 = vrot.lane.b32.xlu0 %v3029_v19, %s3493_s8  ;;  %v3104_v19 = vpack.i.bf16 %v1278_v16, %v1277_v15 }
 0x10a   : > { %3035 = vrot.lane.b32.xlu1 %v3034_v24, %s3493_s8  ;;  %v462_v24 = vld [vmem:[#allocation2 + $0x21] sm:$0xff] }
 0x10d   : > { %3040 = vrot.lane.b32.xlu0 %v3039_v39, %s3493_s8 }
 0x10e   : > { %3045 = vrot.lane.b32.xlu1 %v3044_v46, %s3493_s8 }
 0x111   : > { %3050 = vrot.lane.b32.xlu0 %v3049_v51, %s3493_s8 }
 0x112   : > { %3055 = vrot.lane.b32.xlu1 %v3059_v58, %s3493_s8 }
 0x115   : > { %3060 = vrot.lane.b32.xlu0 %v3059_v58, %s3493_s8 }
 0x116   : > { %3065 = vrot.lane.b32.xlu1 %v3064_v63, %s3493_s8 }
 0x119   : > { %3070 = vrot.lane.b32.xlu0 %v3069_v3, %s3493_s8 }
 0x11a   : > { %3075 = vrot.lane.b32.xlu1 %v3079_v6, %s3493_s8 }
 0x11d   : > { %3080 = vrot.lane.b32.xlu0 %v3079_v6, %s3493_s8 }
 0x11e   : > { %3085 = vrot.lane.b32.xlu1 %v3084_v9, %s3493_s8 }
 0x121   : > { %3090 = vrot.lane.b32.xlu0 %v3089_v12, %s3493_s8 }
 0x122   : > { %3095 = vrot.lane.b32.xlu1 %v3094_v14, %s3493_s8 }
 0x125   : > { %3100 = vrot.lane.b32.xlu0 %v3099_v17, %s3493_s8 }
 0x126   : > { %3105 = vrot.lane.b32.xlu1 %v3104_v19, %s3493_s8 }
 0x15b   : > { %v2951_v20 = vpop.permute.xlu0 %2950 }
 0x15c   : > { %v2953_v28 = vunpack.i.h.bf16 %v2951_v20  ;;  %v2952_v30 = vunpack.i.l.bf16 %v2951_v20  ;;  %v2961_v31 = vpop.permute.xlu1 %2960 }
 0x15d   : > { %v2963_v34 = vunpack.i.h.bf16 %v2961_v31  ;;  %v2962_v39 = vunpack.i.l.bf16 %v2961_v31 }
 0x15e   : > { %v655_v40 = vsel %vm383_vm0, %v462_v24, %v2952_v30  ;;  %v656_v46 = vsel %vm383_vm0, %v3958_v35, %v2953_v28 }
 0x15f   : > { %v2956_v62 = vpop.permute.xlu0 %2955  ;;  %v680_v18 = vpack.c.bf16 %v656_v46, %v655_v40  ;;  %v657_v50 = vsel %vm383_vm0, %v3960_v36, %v2962_v39  ;;  %v658_v51 = vsel %vm383_vm0, %v3976_v44, %v2963_v34 }
 0x160   : > { %v2958_v54 = vunpack.i.h.bf16 %v2956_v62  ;;  %v2957_v57 = vunpack.i.l.bf16 %v2956_v62  ;;  %v2966_v58 = vpop.permute.xlu1 %2965  ;;  %v685_v3 = vpack.c.bf16 %v658_v51, %v657_v50 }
 0x161   : > { %1038 = vmatprep.mubr.bf16.mxu0 %v680_v18  ;;  %v2967_v59 = vunpack.i.l.bf16 %v2966_v58  ;;  %v2968_v60 = vunpack.i.h.bf16 %v2966_v58  ;;  %v3144_v18 = vld [vmem:[#allocation7 + $0x120] sm:$0xff]  }
 0x162   : > { %v647_v63 = vsel %vm383_vm0, %v446_v49, %v2957_v57  ;;  %v648_v35 = vsel %vm383_vm0, %v3926_v21, %v2958_v54  ;;  %v3145_v54 = vld [vmem:[#allocation7 + $0x168] sm:$0xff]  }
 0x163   : > { %v2971_v6 = vpop.permute.xlu0 %2970  ;;  %v679_v9 = vpack.c.bf16 %v648_v35, %v647_v63  ;;  %v649_v16 = vsel %vm383_vm0, %v3928_v22, %v2967_v59  ;;  %v650_v19 = vsel %vm383_vm0, %v3930_v23, %v2968_v60  ;;  %v3152_v60 = vld [vmem:[#allocation7 + $0x118] sm:$0xff]  }
 0x164   : > { %v2973_v11 = vunpack.i.h.bf16 %v2971_v6  ;;  %v2972_v12 = vunpack.i.l.bf16 %v2971_v6  ;;  %v2976_v13 = vpop.permute.xlu1 %2975  ;;  %v684_v40 = vpack.c.bf16 %v650_v19, %v649_v16 }
 0x165   : > { %1039 = vmatmul.mubr.bf16.vlgmr.msra.gmra.mrb[0].mxu0 %v679_v9  ;;  %v2978_v14 = vunpack.i.h.bf16 %v2976_v13  ;;  %v2977_v15 = vunpack.i.l.bf16 %v2976_v13 }
 0x166   : > { %2774 = vmatpush3.bf16.msra.mxu0 %v4026_v43  ;;  %1046 = vmatprep.mubr.bf16.mxu0 %v685_v3  ;;  %v671_v17 = vsel %vm383_vm0, %v3928_v22, %v2972_v12  ;;  %v672_v21 = vsel %vm383_vm0, %v3930_v23, %v2973_v11  ;;  %v3147_v43 = vld [vmem:[#allocation7 + $0x110] sm:$0xff]  }
 0x167   : > { %v2981_v20 = vpop.permute.xlu0 %2980  ;;  %v682_v24 = vpack.c.bf16 %v672_v21, %v671_v17  ;;  %2775 = vmatprep.subr.bf16.mxu0 %v3142_v10  ;;  %v659_v28 = vsel %vm383_vm0, %v3978_v45, %v2977_v15  ;;  %v660_v30 = vsel %vm383_vm0, %v3991_v55, %v2978_v14  ;;  %v3148_v12 = vld [vmem:[#allocation7 + $0x170] sm:$0xff]   ;;  %v3157_v17 = vld [vmem:[#allocation7 + $0x1e0] sm:$0xff]  }
 0x168   : > { %v2983_v31 = vunpack.i.h.bf16 %v2981_v20  ;;  %v2982_v34 = vunpack.i.l.bf16 %v2981_v20  ;;  %v2986_v39 = vpop.permute.xlu1 %2985  ;;  %v690_v49 = vpack.c.bf16 %v660_v30, %v659_v28  ;;  %v3149_v28 = vld [vmem:[#allocation7 + $0x130] sm:$0xff]  }
 0x169   : > { %v2987_v22 = vunpack.i.l.bf16 %v2986_v39  ;;  %1103 = vmatprep.mubr.bf16.mxu1 %v682_v24  ;;  %v2988_v46 = vunpack.i.h.bf16 %v2986_v39 }
 0x16a   : > { %v663_v23 = vsel %vm383_vm0, %v3936_v26, %v2982_v34  ;;  %v664_v62 = vsel %vm383_vm0, %v3938_v27, %v2983_v31  ;;  %2776 = vmatpush3.bf16.msra.mxu0 %v3142_v10  ;;  %v3146_v27 = vld [vmem:[#allocation7 + $0x128] sm:$0xff]   ;;  %v3150_v34 = vld [vmem:[#allocation7 + $0x178] sm:$0xff]  }
 0x16b   : > { %v2991_v50 = vpop.permute.xlu0 %2990  ;;  %v681_v51 = vpack.c.bf16 %v664_v62, %v663_v23  ;;  %2777 = vmatprep.subr.bf16.mxu0 %v3147_v43  ;;  %v651_v26 = vsel %vm383_vm0, %v3934_v25, %v2987_v22  ;;  %v652_v9 = vsel %vm383_vm0, %v3950_v32, %v2988_v46 }
 0x16c   : > { %v2993_v57 = vunpack.i.h.bf16 %v2991_v50  ;;  %v2992_v58 = vunpack.i.l.bf16 %v2991_v50  ;;  %v2996_v59 = vpop.permute.xlu1 %2995  ;;  %v689_v19 = vpack.c.bf16 %v652_v9, %v651_v26 }
 0x16d   : > { %1047 = vmatmul.mubr.bf16.gmra.mrb[4].mxu0 %v684_v40  ;;  %1104 = vmatmul.mubr.bf16.vlgmr.msra.gmra.mrb[0].mxu1 %v681_v51  ;;  %v2998_v63 = vunpack.i.h.bf16 %v2996_v59  ;;  %v2997_v35 = vunpack.i.l.bf16 %v2996_v59  ;;  %v502_v59 = vld [vmem:[#allocation2 + $0xf7] sm:$0xff] }
 0x16e   : > { %2675 = vmatpush3.bf16.msra.mxu1 %v3144_v18  ;;  %1054 = vmatprep.mubr.bf16.mxu0 %v690_v49  ;;  %v673_v3 = vsel %vm383_vm0, %v3934_v25, %v2992_v58  ;;  %v674_v6 = vsel %vm383_vm0, %v3950_v32, %v2993_v57  ;;  %v3153_v57 = vld [vmem:[#allocation7 + $0x180] sm:$0xff]  }
 0x16f   : > { %v3001_v10 = vpop.permute.xlu0 %3000  ;;  %2676 = vmatprep.subr.bf16.mxu1 %v3145_v54  ;;  %v687_v11 = vpack.c.bf16 %v674_v6, %v673_v3  ;;  %2778 = vmatpush3.bf16.msra.mxu0 %v3147_v43  ;;  %v661_v13 = vsel %vm383_vm0, %v3993_v56, %v2997_v35  ;;  %v662_v14 = vsel %vm383_vm0, %v4003_v1, %v2998_v63 }
 0x170   : > { %v3003_v15 = vunpack.i.h.bf16 %v3001_v10  ;;  %v3002_v16 = vunpack.i.l.bf16 %v3001_v10  ;;  %v3006_v25 = vpop.permute.xlu1 %3005  ;;  %2779 = vmatprep.subr.bf16.mxu0 %v3152_v60  ;;  %v695_v30 = vpack.c.bf16 %v662_v14, %v661_v13  ;;  %v683_v10 = vpack.c.bf16 %v3976_v44, %v3960_v36  ;;  %v3158_v36 = vld [vmem:[#allocation7 + $0x190] sm:$0xff]  }
 0x171   : > { %v3007_v21 = vunpack.i.l.bf16 %v3006_v25  ;;  %1111 = vmatprep.mubr.bf16.mxu1 %v687_v11  ;;  %v3008_v32 = vunpack.i.h.bf16 %v3006_v25  ;;  %v1255_v25 = vld [vmem:[#allocation2 + $0xa] sm:$0xff] }
 0x172   : > { %2677 = vmatpush3.bf16.msra.mxu1 %v3146_v27  ;;  %v665_v20 = vsel %vm383_vm0, %v3942_v29, %v3002_v16  ;;  %v666_v24 = vsel %vm383_vm0, %v3962_v37, %v3003_v15  ;;  %v3151_v37 = vld [vmem:[#allocation7 + $0x138] sm:$0xff]   ;;  %v3154_v27 = vld [vmem:[#allocation7 + $0x140] sm:$0xff]   ;;  %v3156_v15 = vld [vmem:[#allocation7 + $0x148] sm:$0xff]  }
 0x173   : > { %v686_v43 = vpack.c.bf16 %v666_v24, %v665_v20  ;;  %2678 = vmatprep.subr.bf16.mxu1 %v3148_v12  ;;  %v3011_v31 = vpop.permute.xlu0 %3010  ;;  %2780 = vmatpush3.bf16.msra.mxu0 %v3152_v60  ;;  %v653_v29 = vsel %vm383_vm0, %v3952_v33, %v3007_v21  ;;  %v654_v49 = vsel %vm383_vm0, %v3972_v41, %v3008_v32  ;;  %v3159_v24 = vld [vmem:[#allocation7 + $0x1a0] sm:$0xff]  }
 0x174   : > { %v3013_v39 = vunpack.i.h.bf16 %v3011_v31  ;;  %v3012_v22 = vunpack.i.l.bf16 %v3011_v31  ;;  %v3016_v40 = vpop.permute.xlu1 %3015  ;;  %2714 = vmatprep.subr.bf16.mxu0 %v3157_v17  ;;  %v694_v35 = vpack.c.bf16 %v654_v49, %v653_v29  ;;  %v1256_v17 = vld [vmem:[#allocation2 + $0x22] sm:$0xff]  ;;  %v688_v32 = vpack.c.bf16 %v3991_v55, %v3978_v45 }
 0x175   : > { %1055 = vmatmul.mubr.bf16.gmra.mrb[8].mxu0 %v689_v19  ;;  %1112 = vmatmul.mubr.bf16.gmra.mrb[4].mxu1 %v686_v43  ;;  %v3018_v46 = vunpack.i.h.bf16 %v3016_v40  ;;  %v3017_v23 = vunpack.i.l.bf16 %v3016_v40  ;;  %v1239_v31 = vld [vmem:[#allocation2 + $0x6] sm:$0xff] }
 0x176   : > { %2679 = vmatpush3.bf16.msra.mxu1 %v3149_v28  ;;  %1062 = vmatprep.mubr.bf16.mxu0 %v695_v30  ;;  %v675_v62 = vsel %vm383_vm0, %v3952_v33, %v3012_v22  ;;  %v676_v18 = vsel %vm383_vm0, %v3972_v41, %v3013_v39  ;;  %v1240_v28 = vld [vmem:[#allocation2 + $0x1e] sm:$0xff]  ;;  %v3163_v49 = vld [vmem:[#allocation7 + $0x1a8] sm:$0xff]  }
 0x177   : > { %2680 = vmatprep.subr.bf16.mxu1 %v3150_v34  ;;  %v692_v50 = vpack.c.bf16 %v676_v18, %v675_v62  ;;  %v667_v51 = vsel %vm383_vm0, %v3964_v38, %v3017_v23  ;;  %v668_v54 = vsel %vm383_vm0, %v3981_v47, %v3018_v46  ;;  %v3021_v58 = vpop.permute.xlu0 %3020  ;;  %v3155_v47 = vld [vmem:[#allocation7 + $0x188] sm:$0xff]   ;;  %v3162_v39 = vld [vmem:[#allocation7 + $0x198] sm:$0xff]   ;;  %v693_v46 = vpack.c.bf16 %v4003_v1, %v3993_v56  ;;  %v3165_v56 = vld [vmem:[#allocation7 + $0x1f0] sm:$0xff]  }
 0x178   : > { %v3023_v60 = vunpack.i.h.bf16 %v3021_v58  ;;  %v3022_v63 = vunpack.i.l.bf16 %v3021_v58  ;;  %v3026_v33 = vpop.permute.xlu1 %3025  ;;  %v691_v26 = vpack.c.bf16 %v668_v54, %v667_v51  ;;  %v3161_v34 = vld [vmem:[#allocation7 + $0x1e8] sm:$0xff]   ;;  %v518_v51 = vld [vmem:[#allocation2 + $0xf9] sm:$0xff] }
 0x179   : > { %1119 = vmatprep.mubr.bf16.mxu1 %v692_v50  ;;  %v3028_v41 = vunpack.i.h.bf16 %v3026_v33  ;;  %v3027_v3 = vunpack.i.l.bf16 %v3026_v33  ;;  %v3164_v50 = vld [vmem:[#allocation7 + $0x158] sm:$0xff]   ;;  %v3169_v1 = vld [vmem:[#allocation7 + $0x220] sm:$0xff]  }
 0x17a   : > { %2681 = vmatpush3.bf16.msra.mxu1 %v3151_v37  ;;  %v677_v6 = vsel %vm383_vm0, %v3974_v42, %v3022_v63  ;;  %v678_v38 = vsel %vm383_vm0, %v502_v59, %v3023_v60  ;;  %v1243_v58 = vld [vmem:[#allocation2 + $0x66] sm:$0xff]  ;;  %v1244_v59 = vld [vmem:[#allocation2 + $0x7e] sm:$0xff]  ;;  %v698_v63 = vpack.c.bf16 %v518_v51, %v4005_v2 }
 0x17b   : > { %2682 = vmatprep.subr.bf16.mxu1 %v3153_v57  ;;  %v697_v9 = vpack.c.bf16 %v678_v38, %v677_v6  ;;  %v3031_v11 = vpop.permute.xlu0 %3030  ;;  %v669_v42 = vsel %vm383_vm0, %v3983_v48, %v3027_v3  ;;  %v670_v16 = vsel %vm383_vm0, %v3998_v61, %v3028_v41  ;;  %v3160_v61 = vld [vmem:[#allocation7 + $0x150] sm:$0xff]   ;;  %v3167_v41 = vld [vmem:[#allocation7 + $0x1f8] sm:$0xff]  }
 0x17c   : > { %v3036_v12 = vpop.permute.xlu1 %3035  ;;  %v3033_v13 = vunpack.i.h.bf16 %v3031_v11  ;;  %v3032_v14 = vunpack.i.l.bf16 %v3031_v11  ;;  %v696_v19 = vpack.c.bf16 %v670_v16, %v669_v42  ;;  %v3196_v51 = vld [vmem:[#allocation2 + $0x38] sm:$0xff] }
 0x17d   : > { %1063 = vmatmul.mubr.bf16.gmra.mrb[12].mxu0 %v694_v35  ;;  %1120 = vmatmul.mubr.bf16.gmra.mrb[8].mxu1 %v691_v26  ;;  %v3038_v30 = vunpack.i.h.bf16 %v3036_v12  ;;  %v3037_v43 = vunpack.i.l.bf16 %v3036_v12  ;;  %v3166_v26 = vld [vmem:[#allocation7 + $0x1b0] sm:$0xff]   ;;  %v3170_v12 = vld [vmem:[#allocation7 + $0x200] sm:$0xff]  }
 0x17e   : > { %2683 = vmatpush3.bf16.msra.mxu1 %v3154_v27  ;;  %1127 = vmatprep.mubr.bf16.mxu1 %v697_v9  ;;  %v1440_v20 = vsel %vm383_vm0, %v1255_v25, %v3032_v14  ;;  %v1441_v48 = vsel %vm383_vm0, %v1256_v17, %v3033_v13  ;;  %v3168_v9 = vld [vmem:[#allocation7 + $0x1b8] sm:$0xff]   ;;  %v3171_v25 = vld [vmem:[#allocation7 + $0x1c0] sm:$0xff]  }
 0x17f   : > { %2684 = vmatprep.subr.bf16.mxu1 %v3155_v47  ;;  %2781 = vmatprep.mubr.msk.bf16.mxu0 %vm383_vm0, %v683_v10  ;;  %v3041_v44 = vpop.permute.xlu0 %3040  ;;  %v1465_v45 = vpack.c.bf16 %v1441_v48, %v1440_v20  ;;  %v1433_v62 = vsel %vm383_vm0, %v1240_v28, %v3038_v30  ;;  %v1432_v18 = vsel %vm383_vm0, %v1239_v31, %v3037_v43  ;;  %v3174_v47 = vld [vmem:[#allocation7 + $0x228] sm:$0xff]  }
 0x180   : > { %v4130_v21 = vpop.permute.xlu1 %3045  ;;  %v3043_v22 = vunpack.i.h.bf16 %v3041_v44  ;;  %v3042_v40 = vunpack.i.l.bf16 %v3041_v44  ;;  %v1464_v60 = vpack.c.bf16 %v1433_v62, %v1432_v18  ;;  %v3172_v44 = vld [vmem:[#allocation7 + $0x208] sm:$0xff]   ;;  %v1245_v62 = vld [vmem:[#allocation2 + $0x96] sm:$0xff] }
 0x181   : > { %v3047_v27 = vunpack.i.l.bf16 %v4130_v21  ;;  %v3173_v20 = vld [vmem:[#allocation7 + $0x1c8] sm:$0xff]  }
 0x182   : > { %2685 = vmatpush3.bf16.msra.mxu1 %v3156_v15  ;;  %v1442_v54 = vsel %vm383_vm0, %v4033_v52, %v3042_v40  ;;  %v1443_v57 = vsel %vm383_vm0, %v4035_v53, %v3043_v22  ;;  %v3048_v52 = vunpack.i.h.bf16 %v4130_v21  ;;  %v3179_v15 = vld [vmem:[#allocation7 + $0x230] sm:$0xff]  }
 0x183   : > { %2686 = vmatprep.subr.bf16.mxu1 %v3158_v36  ;;  %v3051_v23 = vpop.permute.xlu0 %3050  ;;  %v1470_v53 = vpack.c.bf16 %v1443_v57, %v1442_v54  ;;  %v1434_v10 = vsel %vm383_vm0, %v4010_v7, %v3047_v27  ;;  %v3176_v22 = vld [vmem:[#allocation7 + $0x1d0] sm:$0xff]  }
 0x184   : > { %v3056_v55 = vpop.permute.xlu1 %3055  ;;  %v3053_v3 = vunpack.i.h.bf16 %v3051_v23  ;;  %v3052_v6 = vunpack.i.l.bf16 %v3051_v23  ;;  %v1435_v11 = vsel %vm383_vm0, %v4012_v8, %v3048_v52  ;;  %v3177_v23 = vld [vmem:[#allocation7 + $0x218] sm:$0xff]   ;;  %v1246_v18 = vld [vmem:[#allocation2 + $0xae] sm:$0xff] }
 0x185   : > { %1128 = vmatmul.mubr.bf16.gmra.mrb[12].mxu1 %v696_v19  ;;  %2782 = vmatmul.mubr.msk.bf16.vlgmr.msra.gmra.mrb[16].mxu0 %vm383_vm0, %v688_v32  ;;  %v3058_v29 = vunpack.i.h.bf16 %v3056_v55  ;;  %v3057_v37 = vunpack.i.l.bf16 %v3056_v55  ;;  %v1469_v42 = vpack.c.bf16 %v1435_v11, %v1434_v10  ;;  %v3180_v32 = vld [vmem:[#allocation7 + $0x238] sm:$0xff]   ;;  %v3198_v11 = vld [vmem:[#allocation2 + $0x80] sm:$0xff] }
 0x186   : > { %2715 = vmatpush3.bf16.msra.mxu0 %v3159_v24  ;;  %2687 = vmatpush3.bf16.msra.mxu1 %v3160_v61  ;;  %v1444_v13 = vsel %vm383_vm0, %v4046_v4, %v3052_v6  ;;  %v1445_v14 = vsel %vm383_vm0, %v4048_v5, %v3053_v3  ;;  %v4160_v4 = vld [vmem:[#allocation2 + $0x9a] sm:$0xff]  ;;  %v4162_v5 = vld [vmem:[#allocation2 + $0xb2] sm:$0xff] }
 0x187   : > { %2716 = vmatprep.subr.bf16.mxu0 %v3161_v34  ;;  %2688 = vmatprep.subr.bf16.mxu1 %v3162_v39  ;;  %v1456_v33 = vsel %vm383_vm0, %v1243_v58, %v3057_v37  ;;  %v1457_v35 = vsel %vm383_vm0, %v1244_v59, %v3058_v29  ;;  %v3061_v38 = vpop.permute.xlu0 %3060  ;;  %v1475_v36 = vpack.c.bf16 %v1445_v14, %v1444_v13  ;;  %v3175_v61 = vld [vmem:[#allocation7 + $0x210] sm:$0xff]  }
 0x188   : > { %2785 = vmatprep.mubr.msk.bf16.mxu0 %vm383_vm0, %v693_v46  ;;  %1825 = vmatprep.mubr.bf16.mxu1 %v1465_v45  ;;  %v1467_v2 = vpack.c.bf16 %v1457_v35, %v1456_v33  ;;  %v3063_v7 = vunpack.i.h.bf16 %v3061_v38  ;;  %v3062_v17 = vunpack.i.l.bf16 %v3061_v38  ;;  %v3066_v8 = vpop.permute.xlu1 %3065  ;;  %v1297_v33 = vld [vmem:[#allocation2 + $0x82] sm:$0xff] }
 0x189   : > { %v3068_v39 = vunpack.i.h.bf16 %v3066_v8  ;;  %v3067_v40 = vunpack.i.l.bf16 %v3066_v8 }
 0x18a   : > { %2717 = vmatpush3.bf16.msra.mxu0 %v3163_v49  ;;  %2689 = vmatpush3.bf16.msra.mxu1 %v3164_v50  ;;  %v1436_v48 = vsel %vm383_vm0, %v1243_v58, %v3062_v17  ;;  %v1437_v24 = vsel %vm383_vm0, %v1244_v59, %v3063_v7  ;;  %v3195_v49 = vld [vmem:[#allocation2 + $0x50] sm:$0xff]  ;;  %v1473_v17 = vpack.c.bf16 %v4162_v5, %v4160_v4 }
 0x18b   : > { %2718 = vmatprep.subr.bf16.mxu0 %v3165_v56  ;;  %2789 = vmatprep.subr.bf16.mxu1 %v3169_v1  ;;  %v3071_v16 = vpop.permute.xlu0 %3070  ;;  %v1474_v34 = vpack.c.bf16 %v1437_v24, %v1436_v48  ;;  %v1449_v50 = vsel %vm383_vm0, %v3195_v49, %v3068_v39  ;;  %v1448_v56 = vsel %vm383_vm0, %v3196_v51, %v3067_v40  ;;  %v1287_v48 = vld [vmem:[#allocation2 + $0x10e] sm:$0xff]  ;;  %v3199_v24 = vld [vmem:[#allocation2 + $0x98] sm:$0xff] }
 0x18c   : > { %v3073_v21 = vunpack.i.h.bf16 %v3071_v16  ;;  %v3072_v19 = vunpack.i.l.bf16 %v3071_v16  ;;  %v3076_v31 = vpop.permute.xlu1 %3075  ;;  %v1301_v16 = vld [vmem:[#allocation2 + $0xe2] sm:$0xff]  ;;  %v3182_v49 = vld [vmem:[#allocation10 + $0x8] sm:$0xff]   ;;  %v3184_v51 = vld [vmem:[#allocation10 + $0x18] sm:$0xff]  }
 0x18d   : > { %2786 = vmatmul.mubr.msk.bf16.gmra.mrb[20].mxu0 %vm383_vm0, %v698_v63  ;;  %1826 = vmatmul.mubr.bf16.vlgmr.msra.gmra.mrb[16].mxu1 %v1464_v60  ;;  %v3078_v29 = vunpack.i.h.bf16 %v3076_v31  ;;  %v3077_v37 = vunpack.i.l.bf16 %v3076_v31  ;;  %v1296_v63 = vld [vmem:[#allocation2 + $0x6a] sm:$0xff] }
 0x18e   : > { %2719 = vmatpush3.bf16.msra.mxu0 %v3166_v26  ;;  %1833 = vmatprep.mubr.bf16.mxu1 %v1470_v53  ;;  %v1446_v30 = vsel %vm383_vm0, %v4160_v4, %v3072_v19  ;;  %v1447_v43 = vsel %vm383_vm0, %v4162_v5, %v3073_v21  ;;  %v1466_v26 = vpack.c.bf16 %v1449_v50, %v1448_v56  ;;  %v1302_v4 = vld [vmem:[#allocation2 + $0xfa] sm:$0xff]  ;;  %v1303_v5 = vld [vmem:[#allocation2 + $0x112] sm:$0xff] }
 0x18f   : > { %2720 = vmatprep.subr.bf16.mxu0 %v3167_v41  ;;  %2790 = vmatpush3.bf16.msra.mxu1 %v3169_v1  ;;  %v3081_v28 = vpop.permute.xlu0 %3080  ;;  %v1480_v55 = vpack.c.bf16 %v1447_v43, %v1446_v30  ;;  %v3178_v1 = vld [vmem:[#allocation7 + $0x1d8] sm:$0xff]   ;;  %v1458_v59 = vsel %vm383_vm0, %v1245_v62, %v3077_v37  ;;  %v1459_v60 = vsel %vm383_vm0, %v1246_v18, %v3078_v29  ;;  %v3202_v29 = vld [vmem:[#allocation2 + $0xe0] sm:$0xff] }
 0x190   : > { %2791 = vmatprep.subr.bf16.mxu1 %v3174_v47  ;;  %1890 = vmatprep.mubr.bf16.mxu0 %v1467_v2  ;;  %v3083_v46 = vunpack.i.h.bf16 %v3081_v28  ;;  %v3082_v45 = vunpack.i.l.bf16 %v3081_v28  ;;  %v3086_v58 = vpop.permute.xlu1 %3085  ;;  %v1472_v41 = vpack.c.bf16 %v1459_v60, %v1458_v59  ;;  %v1468_v3 = vpack.c.bf16 %v1297_v33, %v1296_v63  ;;  %v1285_v2 = vld [vmem:[#allocation2 + $0xde] sm:$0xff]  ;;  %v3200_v28 = vld [vmem:[#allocation2 + $0xb0] sm:$0xff] }
 0x191   : > { %v3088_v27 = vunpack.i.h.bf16 %v3086_v58  ;;  %v3087_v53 = vunpack.i.l.bf16 %v3086_v58  ;;  %v3183_v50 = vld [vmem:[#allocation10 + $0x10] sm:$0xff]   ;;  %v2467_v33 = vld [vmem:[#allocation9] ss:$0 sm:$0xff] }
 0x192   : > { %2721 = vmatpush3.bf16.msra.mxu0 %v3168_v9  ;;  %v1438_v54 = vsel %vm383_vm0, %v1245_v62, %v3082_v45  ;;  %v1439_v57 = vsel %vm383_vm0, %v1246_v18, %v3083_v46  ;;  %v3197_v9 = vld [vmem:[#allocation2 + $0x68] sm:$0xff]  ;;  %v3185_v56 = vld [vmem:[#allocation13 + $0x10] sm:$0xff]  }
 0x193   : > { %2722 = vmatprep.subr.bf16.mxu0 %v3170_v12  ;;  %2792 = vmatpush3.bf16.msra.mxu1 %v3174_v47  ;;  %v3091_v35 = vpop.permute.xlu0 %3090  ;;  %v1479_v52 = vpack.c.bf16 %v1439_v57, %v1438_v54  ;;  %v1284_v47 = vld [vmem:[#allocation2 + $0xc6] sm:$0xff]  ;;  %v1450_v10 = vsel %vm383_vm0, %v3197_v9, %v3087_v53  ;;  %v1451_v12 = vsel %vm383_vm0, %v3198_v11, %v3088_v27 }
 0x194   : > { %2793 = vmatprep.subr.bf16.mxu1 %v3179_v15  ;;  %v3093_v6 = vunpack.i.h.bf16 %v3091_v35  ;;  %v3092_v38 = vunpack.i.l.bf16 %v3091_v35  ;;  %v3096_v13 = vpop.permute.xlu1 %3095  ;;  %v1471_v7 = vpack.c.bf16 %v1451_v12, %v1450_v10  ;;  %v3181_v18 = vld [vmem:[#allocation10] sm:$0xff]  }
 0x195   : > { %1834 = vmatmul.mubr.bf16.gmra.mrb[20].mxu1 %v1469_v42  ;;  %v1300_v42 = vld [vmem:[#allocation2 + $0xca] sm:$0xff]  ;;  %v3097_v8 = vunpack.i.l.bf16 %v3096_v13 }
 0x196   : > { %2723 = vmatpush3.bf16.msra.mxu0 %v3171_v25  ;;  %1841 = vmatprep.mubr.bf16.mxu1 %v1475_v36  ;;  %v1460_v14 = vsel %vm383_vm0, %v1284_v47, %v3092_v38  ;;  %v3098_v36 = vunpack.i.h.bf16 %v3096_v13  ;;  %v1478_v21 = vpack.c.bf16 %v1301_v16, %v1300_v42 }
 0x197   : > { %2724 = vmatprep.subr.bf16.mxu0 %v3172_v44  ;;  %2794 = vmatpush3.bf16.msra.mxu1 %v3179_v15  ;;  %v1461_v15 = vsel %vm383_vm0, %v1285_v2, %v3093_v6  ;;  %v3101_v25 = vpop.permute.xlu0 %3100 }
 0x198   : > { %2795 = vmatprep.subr.bf16.mxu1 %v3180_v32  ;;  %v1477_v44 = vpack.c.bf16 %v1461_v15, %v1460_v14  ;;  %v3103_v19 = vunpack.i.h.bf16 %v3101_v25  ;;  %v1453_v30 = vsel %vm383_vm0, %v3200_v28, %v3098_v36  ;;  %v3106_v43 = vpop.permute.xlu1 %3105 }
 0x199   : > { %v3108_v40 = vunpack.i.h.bf16 %v3106_v43  ;;  %v3107_v46 = vunpack.i.l.bf16 %v3106_v43 }
 0x19a   : > { %2725 = vmatpush3.bf16.msra.mxu0 %v3173_v20  ;;  %v1286_v20 = vld [vmem:[#allocation2 + $0xf6] sm:$0xff] }
 0x19b   : > { %2726 = vmatprep.subr.bf16.mxu0 %v3175_v61  ;;  %2796 = vmatpush3.bf16.msra.mxu1 %v3180_v32  ;;  %v3102_v32 = vunpack.i.l.bf16 %v3101_v25  ;;  %v1452_v61 = vsel %vm383_vm0, %v3199_v24, %v3097_v8  ;;  %v1455_v37 = vsel %vm383_vm0, %v3202_v29, %v3108_v40 }
 0x19c   : > { %2805 = vmatprep.subr.bf16.mxu1 %v3492_v0  ;;  %v1476_v39 = vpack.c.bf16 %v1453_v30, %v1452_v61 }
 0x19d   : > { %1842 = vmatmul.mubr.bf16.gmra.mrb[24].mxu1 %v1474_v34  ;;  %v1462_v31 = vsel %vm383_vm0, %v1286_v20, %v3102_v32  ;;  %v1463_v34 = vsel %vm383_vm0, %v1287_v48, %v3103_v19 }
 0x19e   : > { %2727 = vmatpush3.bf16.msra.mxu0 %v3176_v22  ;;  %1849 = vmatprep.mubr.bf16.mxu1 %v1480_v55  ;;  %v1483_v22 = vpack.c.bf16 %v1303_v5, %v1302_v4  ;;  %v1482_v45 = vpack.c.bf16 %v1463_v34, %v1462_v31  ;;  %v3201_v55 = vld [vmem:[#allocation2 + $0xc8] sm:$0xff] }
 0x19f   : > { %2728 = vmatprep.subr.bf16.mxu0 %v3177_v23  ;;  %v1454_v23 = vsel %vm383_vm0, %v3201_v55, %v3107_v46 }
 0x1a0   : > { %v1481_v62 = vpack.c.bf16 %v1455_v37, %v1454_v23 }
 0x1a2   : > { %2729 = vmatpush3.bf16.msra.mxu0 %v3178_v1  ;;  %v3186_v1 = vld [vmem:[#allocation13 + $0x18] sm:$0xff]  }
 0x1a3   : > { %2825 = vmatprep.subr.bf16.mxu0 %v3492_v0 }
 0x1a5   : > { %1891 = vmatmul.mubr.bf16.vlgmr.msra.gmra.mrb[24].mxu0 %v1466_v26  ;;  %1850 = vmatmul.mubr.bf16.gmra.mrb[28].mxu1 %v1479_v52 }
 0x1a6   : > { %1898 = vmatprep.mubr.bf16.mxu0 %v1472_v41  ;;  %2797 = vmatprep.mubr.msk.bf16.mxu1 %vm383_vm0, %v1468_v3 }
 0x1a7   : > { %2826 = vmatpush3.bf16.msra.mxu0 %v3185_v56 }
 0x1a8   : > { %2827 = vmatprep.subr.bf16.mxu0 %v3492_v0 }
 0x1ab   : > { %2828 = vmatpush3.bf16.msra.mxu0 %v3186_v1 }
 0x1ad   : > { %1899 = vmatmul.mubr.bf16.gmra.mrb[28].mxu0 %v1471_v7  ;;  %2798 = vmatmul.mubr.msk.bf16.vlgmr.msra.gmra.mrb[32].mxu1 %vm383_vm0, %v1473_v17 }
 0x1ae   : > { %1906 = vmatprep.mubr.bf16.mxu0 %v1477_v44  ;;  %2801 = vmatprep.mubr.msk.bf16.mxu1 %vm383_vm0, %v1478_v21 }
 0x1af   : > { %2806 = vmatpush3.bf16.msra.mxu1 %v3181_v18 }
 0x1b0   : > { %2807 = vmatprep.subr.bf16.mxu1 %v3492_v0 }
 0x1b3   : > { %2808 = vmatpush3.bf16.msra.mxu1 %v3182_v49 }
 0x1b4   : > { %2809 = vmatprep.subr.bf16.mxu1 %v3492_v0 }
 0x1b5   : > { %1907 = vmatmul.mubr.bf16.gmra.mrb[32].mxu0 %v1476_v39  ;;  %2802 = vmatmul.mubr.msk.bf16.gmra.mrb[36].mxu1 %vm383_vm0, %v1483_v22 }
 0x1b6   : > { %1914 = vmatprep.mubr.bf16.mxu0 %v1482_v45  ;;  %2813 = vmatprep.mubr.msk.bf16.mxu1 %vm3494_vm1, %v3492_v0 }
 0x1b7   : > { %2810 = vmatpush3.bf16.msra.mxu1 %v3183_v50 }
 0x1b8   : > { %2811 = vmatprep.subr.bf16.mxu1 %v3492_v0 }
 0x1bb   : > { %2812 = vmatpush3.bf16.msra.mxu1 %v3184_v51 }
 0x1bc   : > { %2817 = vmatprep.subr.bf16.mxu1 %v3492_v0 }
 0x1bd   : > { %1915 = vmatmul.mubr.bf16.gmra.mrb[36].mxu0 %v1481_v62 }
 0x1be   : > { %2829 = vmatprep.mubr.msk.bf16.mxu0 %vm3494_vm1, %v3492_v0 }
 0x238   : > { %v2602_v54 = vpop.f32.mrb[0].mxu0 }
 0x239   : > { %v2603_v57 = vpop.f32.mrb[1].mxu0 }
 0x23a   : > { %v2604_v58 = vadd.f32 %v2603_v57, %v2602_v54  ;;  %v2605_v59 = vpop.f32.mrb[2].mxu0 }
 0x23b   : > { %v2606_v60 = vpop.f32.mrb[3].mxu0 }
 0x23c   : > { %v2607_v63 = vadd.f32 %v2606_v60, %v2605_v59  ;;  %v1041_v53 = vadd.f32 %v2604_v58, %v2467_v33 }
 0x23e   : > { %v1044_v9 = vadd.f32 %v2607_v63, %v2467_v33 }
 0x240   : > { %v2608_v35 = vpop.f32.mrb[4].mxu0  ;;  %v2642_v26 = vpop.f32.mrb[0].mxu1 }
 0x241   : > { %v2609_v52 = vpop.f32.mrb[5].mxu0  ;;  %v2643_v27 = vpop.f32.mrb[1].mxu1 }
 0x242   : > { %v2610_v41 = vadd.f32 %v2609_v52, %v2608_v35  ;;  %v2644_v3 = vadd.f32 %v2643_v27, %v2642_v26  ;;  %v2611_v6 = vpop.f32.mrb[6].mxu0  ;;  %v2645_v38 = vpop.f32.mrb[2].mxu1 }
 0x243   : > { %v2612_v47 = vpop.f32.mrb[7].mxu0  ;;  %v2646_v2 = vpop.f32.mrb[3].mxu1 }
 0x244   : > { %v2613_v10 = vadd.f32 %v2612_v47, %v2611_v6  ;;  %v2647_v11 = vadd.f32 %v2646_v2, %v2645_v38  ;;  %v1106_v12 = vadd.f32 %v2644_v3, %v1041_v53  ;;  %v1049_v25 = vadd.f32 %v2610_v41, %v2467_v33 }
 0x246   : > { %v1109_v13 = vadd.f32 %v2647_v11, %v1044_v9  ;;  %v1052_v19 = vadd.f32 %v2613_v10, %v2467_v33 }
 0x248   : > { %v2614_v14 = vpop.f32.mrb[8].mxu0  ;;  %v2648_v15 = vpop.f32.mrb[4].mxu1 }
 0x249   : > { %v2615_v42 = vpop.f32.mrb[9].mxu0  ;;  %v2649_v16 = vpop.f32.mrb[5].mxu1 }
 0x24a   : > { %v2616_v7 = vadd.f32 %v2615_v42, %v2614_v14  ;;  %v2650_v17 = vadd.f32 %v2649_v16, %v2648_v15  ;;  %v2617_v36 = vpop.f32.mrb[10].mxu0  ;;  %v2651_v8 = vpop.f32.mrb[6].mxu1 }
 0x24b   : > { %v2618_v44 = vpop.f32.mrb[11].mxu0  ;;  %v2652_v21 = vpop.f32.mrb[7].mxu1 }
 0x24c   : > { %v2619_v32 = vadd.f32 %v2618_v44, %v2617_v36  ;;  %v2653_v20 = vadd.f32 %v2652_v21, %v2651_v8  ;;  %v1114_v48 = vadd.f32 %v2650_v17, %v1049_v25  ;;  %v1057_v5 = vadd.f32 %v2616_v7, %v2467_v33 }
 0x24e   : > { %v1117_v24 = vadd.f32 %v2653_v20, %v1052_v19  ;;  %v1060_v46 = vadd.f32 %v2619_v32, %v2467_v33 }
 0x250   : > { %v2620_v61 = vpop.f32.mrb[12].mxu0  ;;  %v2654_v28 = vpop.f32.mrb[8].mxu1 }
 0x251   : > { %v2621_v30 = vpop.f32.mrb[13].mxu0  ;;  %v2655_v4 = vpop.f32.mrb[9].mxu1 }
 0x252   : > { %v2622_v43 = vadd.f32 %v2621_v30, %v2620_v61  ;;  %v2656_v31 = vadd.f32 %v2655_v4, %v2654_v28  ;;  %v2623_v34 = vpop.f32.mrb[14].mxu0  ;;  %v2657_v39 = vpop.f32.mrb[10].mxu1 }
 0x253   : > { %v2624_v22 = vpop.f32.mrb[15].mxu0  ;;  %v2658_v40 = vpop.f32.mrb[11].mxu1 }
 0x254   : > { %v2625_v45 = vadd.f32 %v2624_v22, %v2623_v34  ;;  %v2659_v55 = vadd.f32 %v2658_v40, %v2657_v39  ;;  %v1122_v23 = vadd.f32 %v2656_v31, %v1057_v5  ;;  %v1065_v51 = vadd.f32 %v2622_v43, %v2467_v33 }
 0x256   : > { %v1125_v29 = vadd.f32 %v2659_v55, %v1060_v46  ;;  %v1068_v58 = vadd.f32 %v2625_v45, %v2467_v33 }
 0x258   : > { %v2660_v37 = vpop.f32.mrb[12].mxu1  ;;  %v2783_v62 = vpop.f32.mrb[16].mxu0 }
 0x259   : > { %v1179_v18 = vadd.f32 %v2783_v62, %v1114_v48  ;;  %v2661_v49 = vpop.f32.mrb[13].mxu1  ;;  %v1170_v50 = vpop.f32.mrb[17].mxu0 }
 0x25a   : > { %v2662_v56 = vadd.f32 %v2661_v49, %v2660_v37  ;;  %v1171_v1 = vadd.f32 %v1170_v50, %v1106_v12  ;;  %v2663_v54 = vpop.f32.mrb[14].mxu1  ;;  %v2784_v57 = vpop.f32.mrb[18].mxu0 }
 0x25b   : > { %v1182_v59 = vadd.f32 %v2784_v57, %v1117_v24  ;;  %v2664_v60 = vpop.f32.mrb[15].mxu1  ;;  %v1173_v63 = vpop.f32.mrb[19].mxu0  ;;  %v1203_v53 = vmax.f32 %v1179_v18, 0.0 }
 0x25c   : > { %v1201_v35 = vmax.f32 %v1171_v1, 0.0  ;;  %v2665_v26 = vadd.f32 %v2664_v60, %v2663_v54  ;;  %v1174_v52 = vadd.f32 %v1173_v63, %v1109_v13  ;;  %v1130_v27 = vadd.f32 %v2662_v56, %v1065_v51  ;;  %v4217_v54 = vld [vmem:[#allocation9 + $0x1] ss:$0 sm:$0xff] }
 0x25d   : > { %v1204_v41 = vmax.f32 %v1182_v59, 0.0  ;;  %v1220_v13 = vsel %vm383_vm0, %v1203_v53, 0.0 }
 0x25e   : > { %v1202_v3 = vmax.f32 %v1174_v52, 0.0  ;;  %v1133_v6 = vadd.f32 %v2665_v26, %v1068_v58  ;;  %v1217_v47 = vsel %vm383_vm0, %v1201_v35, 0.0 }
 0x25f   : > { %v1210_v38 = vpack.c.bf16 %v1204_v41, %v1203_v53  ;;  %v1222_v21 = vsel %vm383_vm0, %v1204_v41, 0.0 }
 0x260   : > { %v1209_v2 = vpack.c.bf16 %v1202_v3, %v1201_v35  ;;  %v1218_v9 = vsel %vm383_vm0, %v1202_v3, 0.0  ;;  %v2787_v10 = vpop.f32.mrb[20].mxu0  ;;  %v2690_v11 = vpop.f32.mrb[16].mxu1 }
 0x261   : > { %1214 = vst.msk [vmem:[#allocation3 + $0x8] sm:$0xff] %vm383_vm0, %v1210_v38  ;;  %v1219_v33 = vadd.f32 %v1218_v9, %v1217_v47  ;;  %v1195_v12 = vadd.f32 %v2787_v10, %v1130_v27  ;;  %v1186_v14 = vpop.f32.mrb[21].mxu0  ;;  %v2691_v15 = vpop.f32.mrb[17].mxu1 }
 0x262   : > { %1213 = vst.msk [vmem:[#allocation3] sm:$0xff] %vm383_vm0, %v1209_v2  ;;  %v1187_v42 = vadd.f32 %v1186_v14, %v1122_v23  ;;  %v2788_v16 = vpop.f32.mrb[22].mxu0  ;;  %v2692_v25 = vadd.f32 %v2691_v15, %v2690_v11  ;;  %v2693_v7 = vpop.f32.mrb[18].mxu1 }
 0x263   : > { %v1221_v17 = vadd.f32 %v1220_v13, %v1219_v33  ;;  %v1198_v36 = vadd.f32 %v2788_v16, %v1133_v6  ;;  %v1189_v8 = vpop.f32.mrb[23].mxu0  ;;  %v2694_v44 = vpop.f32.mrb[19].mxu1  ;;  %v1207_v48 = vmax.f32 %v1195_v12, 0.0 }
 0x264   : > { %v1205_v19 = vmax.f32 %v1187_v42, 0.0  ;;  %v1190_v32 = vadd.f32 %v1189_v8, %v1125_v29  ;;  %v2695_v20 = vadd.f32 %v2694_v44, %v2693_v7  ;;  %v1828_v63 = vadd.f32 %v2692_v25, %v4217_v54 }
 0x265   : > { %v1223_v24 = vadd.f32 %v1222_v21, %v1221_v17  ;;  %v1208_v61 = vmax.f32 %v1198_v36, 0.0  ;;  %v1228_v40 = vsel %vm383_vm0, %v1207_v48, 0.0 }
 0x266   : > { %v1224_v28 = vsel %vm383_vm0, %v1205_v19, 0.0  ;;  %v1206_v30 = vmax.f32 %v1190_v32, 0.0  ;;  %v1831_v3 = vadd.f32 %v2695_v20, %v4217_v54 }
 0x267   : > { %v1225_v4 = vadd.f32 %v1224_v28, %v1223_v24  ;;  %v1212_v5 = vpack.c.bf16 %v1208_v61, %v1207_v48  ;;  %v1230_v29 = vsel %vm383_vm0, %v1208_v61, 0.0 }
 0x268   : > { %v1211_v43 = vpack.c.bf16 %v1206_v30, %v1205_v19  ;;  %v1226_v31 = vsel %vm383_vm0, %v1206_v30, 0.0  ;;  %v2696_v34 = vpop.f32.mrb[20].mxu1 }
 0x269   : > { %1216 = vst.msk [vmem:[#allocation3 + $0x18] sm:$0xff] %vm383_vm0, %v1212_v5  ;;  %v1227_v39 = vadd.f32 %v1226_v31, %v1225_v4  ;;  %v2697_v22 = vpop.f32.mrb[21].mxu1 }
 0x26a   : > { %1215 = vst.msk [vmem:[#allocation3 + $0x10] sm:$0xff] %vm383_vm0, %v1211_v43  ;;  %v2698_v46 = vadd.f32 %v2697_v22, %v2696_v34  ;;  %v2699_v45 = vpop.f32.mrb[22].mxu1 }
 0x26b   : > { %v1229_v55 = vadd.f32 %v1228_v40, %v1227_v39  ;;  %v2700_v23 = vpop.f32.mrb[23].mxu1 }
 0x26c   : > { %v2701_v37 = vadd.f32 %v2700_v23, %v2699_v45  ;;  %v1836_v12 = vadd.f32 %v2698_v46, %v4217_v54 }
 0x26d   : > { %v4215_v62 = vadd.f32 %v1230_v29, %v1229_v55 }
 0x26e   : > { %v1839_v16 = vadd.f32 %v2701_v37, %v4217_v54 }
 0x270   : > { %v2702_v18 = vpop.f32.mrb[24].mxu1 }
 0x271   : > { %v2703_v49 = vpop.f32.mrb[25].mxu1 }
 0x272   : > { %v2704_v50 = vadd.f32 %v2703_v49, %v2702_v18  ;;  %v2705_v51 = vpop.f32.mrb[26].mxu1 }
 0x273   : > { %v2706_v56 = vpop.f32.mrb[27].mxu1 }
 0x274   : > { %v2707_v1 = vadd.f32 %v2706_v56, %v2705_v51  ;;  %v1844_v34 = vadd.f32 %v2704_v50, %v4217_v54 }
 0x276   : > { %v1847_v55 = vadd.f32 %v2707_v1, %v4217_v54 }
 0x278   : > { %v2730_v57 = vpop.f32.mrb[24].mxu0  ;;  %v2708_v58 = vpop.f32.mrb[28].mxu1 }
 0x279   : > { %v2731_v59 = vpop.f32.mrb[25].mxu0  ;;  %v2709_v60 = vpop.f32.mrb[29].mxu1 }
 0x27a   : > { %v2732_v35 = vadd.f32 %v2731_v59, %v2730_v57  ;;  %v2733_v26 = vpop.f32.mrb[26].mxu0  ;;  %v4220_v52 = vadd.f32 %v2709_v60, %v2708_v58  ;;  %v2711_v27 = vpop.f32.mrb[30].mxu1 }
 0x27b   : > { %v2734_v53 = vpop.f32.mrb[27].mxu0  ;;  %v2712_v41 = vpop.f32.mrb[31].mxu1 }
 0x27c   : > { %v2735_v6 = vadd.f32 %v2734_v53, %v2733_v26  ;;  %v2713_v38 = vadd.f32 %v2712_v41, %v2711_v27  ;;  %v1893_v47 = vadd.f32 %v2732_v35, %v1828_v63  ;;  %v1852_v53 = vadd.f32 %v4220_v52, %v4217_v54 }
 0x27e   : > { %v1896_v2 = vadd.f32 %v2735_v6, %v1831_v3 }
 0x280   : > { %v2736_v9 = vpop.f32.mrb[28].mxu0  ;;  %v2799_v10 = vpop.f32.mrb[32].mxu1 }
 0x281   : > { %v2737_v11 = vpop.f32.mrb[29].mxu0  ;;  %v1957_v33 = vpop.f32.mrb[33].mxu1 }
 0x282   : > { %v2738_v14 = vadd.f32 %v2737_v11, %v2736_v9  ;;  %v2739_v15 = vpop.f32.mrb[30].mxu0  ;;  %v1958_v13 = vadd.f32 %v1957_v33, %v1893_v47  ;;  %v2800_v42 = vpop.f32.mrb[34].mxu1  ;;  %v1855_v47 = vadd.f32 %v2713_v38, %v4217_v54 }
 0x283   : > { %v2740_v25 = vpop.f32.mrb[31].mxu0  ;;  %v1960_v7 = vpop.f32.mrb[35].mxu1 }
 0x284   : > { %v1901_v17 = vadd.f32 %v2738_v14, %v1836_v12  ;;  %v1988_v36 = vmax.f32 %v1958_v13, 0.0  ;;  %v2741_v8 = vadd.f32 %v2740_v25, %v2739_v15  ;;  %v1961_v44 = vadd.f32 %v1960_v7, %v1896_v2 }
 0x285   : > { %v1232_v12 = vrot.slane %v4215_v62, 4 }
 0x286   : > { %v1966_v21 = vadd.f32 %v2799_v10, %v1901_v17  ;;  %v1904_v19 = vadd.f32 %v2741_v8, %v1839_v16  ;;  %v1989_v32 = vmax.f32 %v1961_v44, 0.0  ;;  %v2005_v20 = vsel %vm383_vm0, %v1988_v36, 0.0 }
 0x287   : > { %v1233_v52 = vadd.f32 %v1232_v12, %v4215_v62 }
 0x288   : > { %v1990_v48 = vmax.f32 %v1966_v21, 0.0  ;;  %v1969_v24 = vadd.f32 %v2800_v42, %v1904_v19  ;;  %v1996_v61 = vpack.c.bf16 %v1989_v32, %v1988_v36  ;;  %v2006_v28 = vsel %vm383_vm0, %v1989_v32, 0.0  ;;  %v2742_v30 = vpop.f32.mrb[32].mxu0  ;;  %v2803_v4 = vpop.f32.mrb[36].mxu1 }
 0x289   : > { %v2007_v5 = vadd.f32 %v2006_v28, %v2005_v20  ;;  %v2743_v43 = vpop.f32.mrb[33].mxu0  ;;  %v1973_v31 = vpop.f32.mrb[37].mxu1  ;;  %v1234_v17 = vrot.slane %v1233_v52, 2 }
 0x28a   : > { %v2008_v39 = vsel %vm383_vm0, %v1990_v48, 0.0  ;;  %v1991_v22 = vmax.f32 %v1969_v24, 0.0  ;;  %2001 = vst.msk [vmem:[#allocation3 + $0x20] sm:$0xff] %vm383_vm0, %v1996_v61  ;;  %v2744_v40 = vadd.f32 %v2743_v43, %v2742_v30  ;;  %v2745_v46 = vpop.f32.mrb[34].mxu0  ;;  %v2804_v45 = vpop.f32.mrb[38].mxu1  ;;  %v3187_v30 = vld [vmem:[#allocation13] sm:$0xff]  }
 0x28b   : > { %v2009_v23 = vadd.f32 %v2008_v39, %v2007_v5  ;;  %v2746_v29 = vpop.f32.mrb[35].mxu0  ;;  %v1976_v37 = vpop.f32.mrb[39].mxu1  ;;  %v1235_v44 = vadd.f32 %v1234_v17, %v1233_v52  ;;  %v3188_v5 = vld [vmem:[#allocation13 + $0x8] sm:$0xff]   ;;  %v2037_v43 = vld [vmem:[#allocation12] sm:$0x1] }
 0x28c   : > { %v1997_v18 = vpack.c.bf16 %v1991_v22, %v1990_v48  ;;  %v2010_v49 = vsel %vm383_vm0, %v1991_v22, 0.0  ;;  %v2747_v51 = vadd.f32 %v2746_v29, %v2745_v46  ;;  %v1909_v56 = vadd.f32 %v2744_v40, %v1844_v34 }
 0x28d   : > { %v2011_v57 = vadd.f32 %v2010_v49, %v2009_v23  ;;  %v1236_v32 = vrot.slane %v1235_v44, 1  ;;  %v2174_v23 = vld [vmem:[#allocation15 + $0x1] sm:$0x1] }
 0x28e   : > { %2002 = vst.msk [vmem:[#allocation3 + $0x28] sm:$0xff] %vm383_vm0, %v1997_v18  ;;  %v1974_v50 = vadd.f32 %v1973_v31, %v1909_v56  ;;  %v1912_v58 = vadd.f32 %v2747_v51, %v1847_v55  ;;  %v2111_v55 = vld [vmem:[#allocation15] sm:$0x1] }
 0x28f   : > { %v1237_v24 = vadd.f32 %v1236_v32, %v1235_v44 }
 0x290   : > { %v1992_v59 = vmax.f32 %v1974_v50, 0.0  ;;  %v1977_v60 = vadd.f32 %v1976_v37, %v1912_v58  ;;  %v2748_v63 = vpop.f32.mrb[36].mxu0 }
 0x291   : > { %v2749_v35 = vpop.f32.mrb[37].mxu0 }
 0x292   : > { %v2012_v26 = vsel %vm383_vm0, %v1992_v59, 0.0  ;;  %v1993_v1 = vmax.f32 %v1977_v60, 0.0  ;;  %v2751_v27 = vpop.f32.mrb[38].mxu0  ;;  %v2750_v3 = vadd.f32 %v2749_v35, %v2748_v63 }
 0x293   : > { %v2013_v41 = vadd.f32 %v2012_v26, %v2011_v57  ;;  %v2752_v6 = vpop.f32.mrb[39].mxu0 }
 0x294   : > { %v1998_v2 = vpack.c.bf16 %v1993_v1, %v1992_v59  ;;  %v2014_v9 = vsel %vm383_vm0, %v1993_v1, 0.0  ;;  %v2753_v10 = vadd.f32 %v2752_v6, %v2751_v27  ;;  %v1917_v33 = vadd.f32 %v2750_v3, %v1852_v53  ;;  %v2239_v6 = vld [vmem:[#allocation3 + $0x8] sm:$0xff] }
 0x295   : > { %v2015_v11 = vadd.f32 %v2014_v9, %v2013_v41  ;;  %v2250_v41 = vlaneseq  ;;  %v2240_v9 = vld [vmem:[#allocation3 + $0x10] sm:$0xff]  ;;  %v2244_v12 = vunpack.c.l.bf16 %v2239_v6 }
 0x296   : > { %2003 = vst.msk [vmem:[#allocation3 + $0x30] sm:$0xff] %vm383_vm0, %v1998_v2  ;;  %v1920_v14 = vadd.f32 %v2753_v10, %v1855_v47  ;;  %v1982_v15 = vadd.f32 %v2803_v4, %v1917_v33  ;;  %v2238_v47 = vld [vmem:[#allocation3] sm:$0xff]  ;;  %v2241_v2 = vld [vmem:[#allocation3 + $0x18] sm:$0xff]  ;;  %v2246_v17 = vunpack.c.l.bf16 %v2240_v9 }
 0x297   : > { %v2251_v3 = vshrl.u32 %v2250_v41, 7  ;;  %v2262_v10 = vld [vmem:[#allocation3 + $0x20] sm:$0xff]  ;;  %v2248_v52 = vunpack.c.l.bf16 %v2241_v2 }
 0x298   : > { %v1985_v13 = vadd.f32 %v2804_v45, %v1920_v14  ;;  %v1994_v42 = vmax.f32 %v1982_v15, 0.0  ;;  %v2245_v14 = vunpack.c.h.bf16 %v2239_v6  ;;  %v2242_v15 = vunpack.c.l.bf16 %v2238_v47 }
 0x299   : > { %v2267_v44 = vunpack.c.h.bf16 %v2262_v10 }
 0x29a   : > { %v1995_v16 = vmax.f32 %v1985_v13, 0.0  ;;  %v2016_v25 = vsel %vm383_vm0, %v1994_v42, 0.0  ;;  %v2243_v13 = vunpack.c.h.bf16 %v2238_v47 }
 0x29b   : > { %v2017_v54 = vadd.f32 %v2016_v25, %v2015_v11  ;;  %v2252_v11 = vsub.s32 0, %v2251_v3 }
 0x29c   : > { %v1999_v38 = vpack.c.bf16 %v1995_v16, %v1994_v42  ;;  %v2018_v7 = vsel %vm383_vm0, %v1995_v16, 0.0  ;;  %v2263_v42 = vld [vmem:[#allocation3 + $0x28] sm:$0xff]  ;;  %v2249_v16 = vunpack.c.h.bf16 %v2241_v2 }
 0x29d   : > { %v2019_v36 = vadd.f32 %v2018_v7, %v2017_v54  ;;  %v2264_v25 = vld [vmem:[#allocation3 + $0x30] sm:$0xff] }
 0x29e   : > { %2004 = vst.msk [vmem:[#allocation3 + $0x38] sm:$0xff] %vm383_vm0, %v1999_v38 }
 0x29f   : > { %v2020_v8 = vrot.slane %v2019_v36, 4 }
 0x2a1   : > { %v2021_v21 = vadd.f32 %v2020_v8, %v2019_v36  ;;  %v2247_v36 = vunpack.c.h.bf16 %v2240_v9  ;;  %v2266_v8 = vunpack.c.l.bf16 %v2262_v10 }
 0x2a3   : > { %v2022_v19 = vrot.slane %v2021_v21, 2 }
 0x2a5   : > { %v2023_v20 = vadd.f32 %v2022_v19, %v2021_v21  ;;  %v2265_v54 = vld [vmem:[#allocation3 + $0x38] sm:$0xff]  ;;  %v2268_v21 = vunpack.c.l.bf16 %v2263_v42  ;;  %v2269_v19 = vunpack.c.h.bf16 %v2263_v42 }
 0x2a7   : > { %v2024_v48 = vrot.slane %v2023_v20, 1 }
 0x2a9   : > { %v2025_v62 = vadd.f32 %v2024_v48, %v2023_v20  ;;  %v2270_v48 = vunpack.c.l.bf16 %v2264_v25 }
 0x2ab   : > { %v2026_v61 = vadd.f32 %v2025_v62, %v1237_v24  ;;  %v2271_v24 = vunpack.c.h.bf16 %v2264_v25  ;;  %v2272_v62 = vunpack.c.l.bf16 %v2265_v54 }
 0x2ad   : > { %v2027_v28 = vmul.f32 0.015625, %v2026_v61  ;;  %v2273_v61 = vunpack.c.h.bf16 %v2265_v54 }
 0x2af   : > { %v2028_v4 = vpack.c.bf16 %v2027_v28, %v2027_v28 }
 0x2b1   : > { %2814 = vmatmul.mubr.msk.bf16.vlgmr.msra.gmra.mrb[40].mxu1 %vm383_vm0, %v2028_v4 }
 0x2b2   : > { %2818 = vmatpush3.bf16.msra.mxu1 %v3187_v30  ;;  %2821 = vmatprep.mubr.msk.bf16.mxu1 %vm3494_vm1, %v3492_v0 }
 0x2b3   : > { %2819 = vmatprep.subr.bf16.mxu1 %v3492_v0 }
 0x2b6   : > { %2820 = vmatpush3.bf16.msra.mxu1 %v3188_v5 }
 0x384   : > { %v2099_v31 = vpop.f32.mrb[40].mxu1 }
 0x385   : > { %v2100_v34 = vadd.f32 %v2099_v31, %v2037_v43  ;;  %v2815_v39 = vpop.f32.mrb[41].mxu1 }
 0x386   : > { %v2102_v22 = vpop.f32.mrb[42].mxu1 }
 0x387   : > { %v2105_v40 = vmax.f32 %v2100_v34, 0.0  ;;  %v2816_v46 = vpop.f32.mrb[43].mxu1 }
 0x389   : > { %v2106_v45 = vpack.c.bf16 %v2105_v40, %v2105_v40 }
 0x38b   : > { %2822 = vmatmul.mubr.msk.bf16.vlgmr.msra.gmra.mrb[44].mxu1 %vm2124_vm2, %v2106_v45  ;;  %2830 = vmatmul.mubr.msk.bf16.vlgmr.msra.gmra.mrb[40].mxu0 %vm2124_vm2, %v2106_v45 }
 0x45e   : > { %v2162_v29 = vpop.f32.mrb[44].mxu1  ;;  %v2221_v37 = vpop.f32.mrb[40].mxu0 }
 0x45f   : > { %v2163_v18 = vadd.f32 %v2162_v29, %v2111_v55  ;;  %v2222_v49 = vadd.f32 %v2221_v37, %v2174_v23  ;;  %v2823_v0 = vpop.f32.mrb[45].mxu1  ;;  %v2831_v51 = vpop.f32.mrb[41].mxu0 }
 0x460   : > { %v2165_v56 = vpop.f32.mrb[46].mxu1  ;;  %v2224_v57 = vpop.f32.mrb[42].mxu0 }
 0x461   : > { %v2227_v50 = vmax.f32 %v2163_v18, %v2222_v49  ;;  %v2824_v58 = vpop.f32.mrb[47].mxu1  ;;  %v2832_v59 = vpop.f32.mrb[43].mxu0 }
 0x463   : > { %v2228_v60 = vsub.f32 %v2163_v18, %v2227_v50  ;;  %v2231_v63 = vsub.f32 %v2222_v49, %v2227_v50 }
 0x465   : > { %v2229_v35 = vmul.f32 1.442695, %v2228_v60  ;;  %v2232_v26 = vmul.f32 1.442695, %v2231_v63 }
 0x467   : > { %3189 = vpow2.f32 %v2229_v35 }
 0x468   : > { %3191 = vpow2.f32 %v2232_v26 }
 0x471   : > { %v3190_v1 = vpop.eup %3189 }
 0x472   : > { %v3192_v27 = vpop.eup %3191 }
 0x473   : > { %v2234_v53 = vadd.f32 %v3192_v27, %v3190_v1 }
 0x475   : > { %3193 = vrcp.f32 %v2234_v53 }
 0x47f   : > { %v3194_v33 = vpop.eup %3193 }
 0x480   : > { %v2236_v38 = vmul.f32 %v3194_v33, %v3190_v1  ;;  %v2237_v7 = vmul.f32 %v3194_v33, %v3192_v27 }
 0x482   : > { %v2253_v32 = vrot.slane %v2236_v38, %v2252_v11  ;;  %v2277_v20 = vrot.slane %v2237_v7, %v2252_v11 }
 0x484   : > { %v2254_v28 = vmul.f32 %v2253_v32, %v2242_v15  ;;  %v2255_v30 = vmul.f32 %v2253_v32, %v2243_v13  ;;  %v2256_v4 = vmul.f32 %v2253_v32, %v2244_v12  ;;  %v2257_v5 = vmul.f32 %v2253_v32, %v2245_v14 }
 0x485   : > { %v2258_v43 = vmul.f32 %v2253_v32, %v2246_v17  ;;  %v2259_v31 = vmul.f32 %v2253_v32, %v2247_v36  ;;  %v2260_v34 = vmul.f32 %v2253_v32, %v2248_v52  ;;  %v2261_v39 = vmul.f32 %v2253_v32, %v2249_v16 }
 0x486   : > { %v2278_v22 = vmul.f32 %v2277_v20, %v2266_v8  ;;  %v2279_v40 = vmul.f32 %v2277_v20, %v2267_v44  ;;  %v2280_v46 = vmul.f32 %v2277_v20, %v2268_v21  ;;  %v2281_v45 = vmul.f32 %v2277_v20, %v2269_v19 }
 0x487   : > { %v2282_v55 = vmul.f32 %v2277_v20, %v2270_v48  ;;  %v2283_v23 = vmul.f32 %v2277_v20, %v2271_v24  ;;  %v2284_v29 = vmul.f32 %v2277_v20, %v2272_v62  ;;  %v2285_v37 = vmul.f32 %v2277_v20, %v2273_v61 }
 0x488   : > { %v2286_v18 = vadd.f32 %v2278_v22, %v2254_v28  ;;  %v2287_v49 = vadd.f32 %v2279_v40, %v2255_v30  ;;  %v2288_v0 = vadd.f32 %v2280_v46, %v2256_v4  ;;  %v2289_v51 = vadd.f32 %v2281_v45, %v2257_v5 }
 0x489   : > { %v2290_v56 = vadd.f32 %v2282_v55, %v2258_v43  ;;  %v2291_v57 = vadd.f32 %v2283_v23, %v2259_v31  ;;  %v2292_v50 = vadd.f32 %v2284_v29, %v2260_v34  ;;  %v2293_v58 = vadd.f32 %v2285_v37, %v2261_v39 }
 0x48a   : > { %2294 = vst.msk [vmem:[%s381_s12] sm:$0xff] %vm383_vm0, %v2286_v18  ;;  %2295 = vst.msk [vmem:[%s381_s12 + $0x8] sm:$0xff] %vm383_vm0, %v2287_v49 }
 0x48b   : > { %2296 = vst.msk [vmem:[%s381_s12 + $0x10] sm:$0xff] %vm383_vm0, %v2288_v0  ;;  %2297 = vst.msk [vmem:[%s381_s12 + $0x18] sm:$0xff] %vm383_vm0, %v2289_v51 }
 0x48c   : > { %2298 = vst.msk [vmem:[%s381_s12 + $0x20] sm:$0xff] %vm383_vm0, %v2290_v56  ;;  %2299 = vst.msk [vmem:[%s381_s12 + $0x28] sm:$0xff] %vm383_vm0, %v2291_v57 }
 0x48d   : > { %2300 = vst.msk [vmem:[%s381_s12 + $0x30] sm:$0xff] %vm383_vm0, %v2292_v50  ;;  %2301 = vst.msk [vmem:[%s381_s12 + $0x38] sm:$0xff] %vm383_vm0, %v2293_v58 }
 0x48e   : > { %3414 = shalt.err (!%p3411_p8)
}
 0x48f   : > { %s3415_s29 = scalar_lea.hbm %s4253_s9, 1024  ;;  %s3419_s10 = scalar_lea.hbm %s4314_s7, 2048 }
 0x490   : > { %p3416_p4 = scmp.ne.s32.totalorder %s4253_s9, %s3415_s29  ;;  %p3420_p3 = scmp.lt.u32.totalorder %s4253_s9, %s4314_s7 }
 0x491   : > { %p3421_p5 = scmp.lt.u32.totalorder %s3419_s10, %s3415_s29  ;;  %p3423_p6 = scmp.lt.u32.totalorder %s3415_s29, %s4253_s9 }
 0x492   : > { %p3417_p10 = pnand %p3416_p4, %p4336_p9 }
 0x493   : > { %p3422_p7 = por %p3421_p5, %p3420_p3 }
 0x494   : > { %p3418_p11 = pneg %p3417_p10 }
 0x495   : > { %p3424_p12 = por %p3423_p6, %p3422_p7 }
 0x497   : > { %p3425_p1 = pnand %p3424_p12, %p3418_p11 }
 0x499   : > { %3428 = shalt.err (!%p3425_p1)
}
 0x49a   : > { %s3496_s17 = smov 128   ;;  %s3497_s14 = smov 8  }
 0x49b   : > { %2859 = dma.vmem_to_hbm [thread:$0]  (%p4336_p9), %s4255_s11, 1024, %s4253_s9, %s2303_s30, %s3496_s17, %s3496_s17, %s3497_s14  }
 0x49c PF: > { %s2331_s22 = sand.u32 1, %s3467_s24   ;;  %p4337_p13 = scmp.ne.s32.totalorder %s4326_s13, 0 }
 0x49d   : > { %p4338_p0 = scmp.ge.s32.totalorder %s3479_s27, 2  ;;  %s2332_s23 = scalar_lea.sflag [#allocation6], %s2331_s22 }
 0x49f   : > { %p2885_p2 = pnand %p4338_p0, %p4337_p13 }
 0x4a1   : > { %3462 = dma.done.wait (!%p2885_p2), %s2332_s23, 1024  }
 0x4a2   : > { %3464 = vsyncadd (!%p2885_p2), %s2332_s23, 4294966272  ;;  %p23_p8 = scmp.ge.s32.totalorder %s3736_s19, 4   ;;  %s4339_s24 = smov %s3471_s25 }
 0x4a3   : > { %s4340_s25 = smov %s3475_s26  ;;  %s4341_s26 = smov %s3747_s18 }
 0x4a4   : > { %s4342_s27 = smov %s3736_s19  ;;  %25 = sbr.rel (!%p23_p8) target bundleno = 8 (0x8), region = 126 }
 0x4ab   :  { %2337 = vsyncpa [#allocation5], 1 }
 0x4ac   :  { %2339 = vsyncpa [#allocation5 + $0x1], 1 }
 0x4ad   :  { %2340 = vsyncpa [#allocation8], 1 }
 0x4ae   :  { %2341 = vsyncpa [#allocation11], 1 }
 0x4af   :  { %2342 = vsyncpa [#allocation14], 1 }
 0x4b0   :  { %2343 = vsyncpa [#allocation6], 1 }
 0x4b1   :  { %2345 = vsyncpa [#allocation6 + $0x1], 1 }

</bundles_post_ra>
